<compile_context>
chip_gen: v7x
topology: tpu7x:2x2x1
jax: 0.10.0
libtpu: 0.0.40
codegen_flags: <defaults>
</compile_context>

<pallas_src>
import functools
import numpy as np
import jax
import jax.numpy as jnp
from jax.experimental import pallas as pl
from jax.experimental.pallas import tpu as pltpu


def _band_weights(w_oihw, W, pad):
    """OIHW conv weights -> fused banded matrix (K*W*Cin, W*Cout).

    big[kh*W*Cin + r*Cin + c, w*Cout + o] = w[o, c, kh, kw]  with r = w + kw - pad
    (zero if r outside [0, W)).  An im2col LHS whose kh-th column block holds the
    h-padded input row (h + kh) therefore performs the full (kh, kw, c) contraction
    of a stride-1 'same' conv, including the zero padding along w, in one matmul.
    """
    Cout, Cin, K, _ = w_oihw.shape
    wt = jnp.transpose(w_oihw, (2, 3, 1, 0))                     # (K, K, Cin, Cout)
    eyes = jnp.stack([jnp.eye(W, W, k=pad - kw, dtype=w_oihw.dtype)
                      for kw in range(K)])                       # (K, W, W)
    big = jnp.einsum("qrw,pqco->prcwo", eyes, wt)                # (K, W, Cin, W, Cout)
    return big.reshape(K * W * Cin, W * Cout)


def _tile_bias(b, W):
    # lane index = w*Cout + o  ->  bias value b[o]
    return jnp.tile(b, W)[None, :]                               # (1, W*Cout)


def error_calibration_module_large_kernel_forward(params, x_nchw, *, b_tile=8,
                                                  compute_dtype=jnp.float32):
    """Forward pass.  x_nchw: (N, input_channels, H, W) -> (N, input_channels, H, W)."""
    N, Cin, H, W = x_nchw.shape
    w1, b1 = params["conv1"]   # 9x9: Cin -> C1
    w3, b3 = params["conv3"]   # 5x5: C1  -> C2
    w2, b2 = params["conv2"]   # 5x5: C2  -> Cf
    C1, C2, Cf = w1.shape[0], w3.shape[0], w2.shape[0]
    K1, P1 = 9, 4
    K2, P2 = 5, 2
    Hp1 = H + 2 * P1
    Hp2 = H + 2 * P2

    # ---- batch tiling: B images folded into the matmul M dim per grid step ----
    B = max(1, min(b_tile, N))
    n_steps = (N + B - 1) // B
    N_pad = n_steps * B
    M = B * H

    # plain-JAX glue: NCHW -> lane-dense (N, H, W*Cin) slab (no h-padding in HBM)
    x = jnp.transpose(x_nchw, (0, 2, 3, 1)).reshape(N, H, W * Cin)
    if N_pad != N:
        x = jnp.pad(x, ((0, N_pad - N), (0, 0), (0, 0)))

    # fused (kh-stacked) banded weights + lane-tiled biases
    w1f = _band_weights(w1, W, P1).astype(compute_dtype)         # (9*W*Cin, W*C1)
    w3f = _band_weights(w3, W, P2).astype(compute_dtype)         # (5*W*C1,  W*C2)
    w2f = _band_weights(w2, W, P2).astype(compute_dtype)         # (5*W*C2,  W*Cf)
    b1b, b3b, b2b = _tile_bias(b1, W), _tile_bias(b3, W), _tile_bias(b2, W)

    def kernel(x_ref, w1_ref, b1_ref, w3_ref, b3_ref, w2_ref, b2_ref, o_ref,
               xp_ref, p1_ref, p2_ref, l1_ref, l3_ref, l2_ref):

        def im2col_matmul(pad_ref, lhs_ref, K, wc_in, w_ref, b_ref):
            # Build the im2col LHS (M, K*wc_in): column block kh holds the padded
            # rows shifted by kh.  Then one deep-K MXU matmul for the whole conv.
            for kh in range(K):
                lhs_ref[:, kh * wc_in:(kh + 1) * wc_in] = (
                    pad_ref[:, kh:kh + H, :].reshape(M, wc_in))
            return jnp.dot(lhs_ref[...], w_ref[...],
                           preferred_element_type=jnp.float32) + b_ref[...]

        # ---- conv1 (9x9) + ReLU : (B, H, W*Cin) -> (M, W*C1) ----
        # zero only the pad rows (interior fully overwritten); done every step so it
        # is correct regardless of how the "parallel" grid is split across cores.
        xp_ref[:, :P1, :] = jnp.zeros((B, P1, W * Cin), xp_ref.dtype)
        xp_ref[:, P1 + H:, :] = jnp.zeros((B, P1, W * Cin), xp_ref.dtype)
        xp_ref[:, P1:P1 + H, :] = x_ref[...].astype(xp_ref.dtype)
        a1 = jnp.maximum(
            im2col_matmul(xp_ref, l1_ref, K1, W * Cin, w1_ref, b1_ref), 0.0)

        # ---- conv3 (5x5) + ReLU : -> (M, W*C2) ----
        p1_ref[:, :P2, :] = jnp.zeros((B, P2, W * C1), p1_ref.dtype)
        p1_ref[:, P2 + H:, :] = jnp.zeros((B, P2, W * C1), p1_ref.dtype)
        p1_ref[:, P2:P2 + H, :] = a1.reshape(B, H, W * C1).astype(p1_ref.dtype)
        a2 = jnp.maximum(
            im2col_matmul(p1_ref, l3_ref, K2, W * C1, w3_ref, b3_ref), 0.0)

        # ---- conv2 (5x5), no ReLU : -> (M, W*Cf) ----
        p2_ref[:, :P2, :] = jnp.zeros((B, P2, W * C2), p2_ref.dtype)
        p2_ref[:, P2 + H:, :] = jnp.zeros((B, P2, W * C2), p2_ref.dtype)
        p2_ref[:, P2:P2 + H, :] = a2.reshape(B, H, W * C2).astype(p2_ref.dtype)
        y = im2col_matmul(p2_ref, l2_ref, K2, W * C2, w2_ref, b2_ref)
        o_ref[...] = y.reshape(B, H, W * Cf).astype(o_ref.dtype)

    out = pl.pallas_call(
        kernel,
        out_shape=jax.ShapeDtypeStruct((N_pad, H, W * Cf), x_nchw.dtype),
        grid_spec=pltpu.PrefetchScalarGridSpec(
            num_scalar_prefetch=0,
            grid=(n_steps,),
            in_specs=[
                pl.BlockSpec((B, H, W * Cin), lambda n: (n, 0, 0)),
                pl.BlockSpec((K1 * W * Cin, W * C1), lambda n: (0, 0)),
                pl.BlockSpec((1, W * C1), lambda n: (0, 0)),
                pl.BlockSpec((K2 * W * C1, W * C2), lambda n: (0, 0)),
                pl.BlockSpec((1, W * C2), lambda n: (0, 0)),
                pl.BlockSpec((K2 * W * C2, W * Cf), lambda n: (0, 0)),
                pl.BlockSpec((1, W * Cf), lambda n: (0, 0)),
            ],
            out_specs=pl.BlockSpec((B, H, W * Cf), lambda n: (n, 0, 0)),
            scratch_shapes=[
                pltpu.VMEM((B, Hp1, W * Cin), compute_dtype),      # h-padded input
                pltpu.VMEM((B, Hp2, W * C1), compute_dtype),       # h-padded act1
                pltpu.VMEM((B, Hp2, W * C2), compute_dtype),       # h-padded act2
                pltpu.VMEM((M, K1 * W * Cin), compute_dtype),      # im2col conv1
                pltpu.VMEM((M, K2 * W * C1), compute_dtype),       # im2col conv3
                pltpu.VMEM((M, K2 * W * C2), compute_dtype),       # im2col conv2
            ],
        ),
        compiler_params=pltpu.CompilerParams(
            dimension_semantics=("parallel",)),
    )(x, w1f, b1b, w3f, b3b, w2f, b2b)

    out = out[:N].reshape(N, H, W, Cf)
    return jnp.transpose(out, (0, 3, 1, 2))                      # NHWC -> NCHW


def init_params(key, input_channels, num_channels):
    """Deterministic init mirroring nn.Conv2d defaults (uniform +-1/sqrt(fan_in))."""
    def conv_init(k, cout, cin, ksize):
        kw, kb = jax.random.split(k)
        fan_in = cin * ksize * ksize
        bound = 1.0 / np.sqrt(fan_in)
        w = jax.random.uniform(kw, (cout, cin, ksize, ksize), jnp.float32,
                               -bound, bound)
        b = jax.random.uniform(kb, (cout,), jnp.float32, -bound, bound)
        return w, b

    k1, k2, k3 = jax.random.split(key, 3)
    return {
        "conv1": conv_init(k1, num_channels, input_channels, 9),
        "conv3": conv_init(k2, num_channels // 2, num_channels, 5),
        "conv2": conv_init(k3, input_channels, num_channels // 2, 5),
    }


def _reference_forward(params, x_nchw):
    """Pure-JAX (XLA conv) reference for correctness checking."""
    def conv(x, w, b, pad):
        y = jax.lax.conv_general_dilated(
            x, w, window_strides=(1, 1),
            padding=[(pad, pad), (pad, pad)],
            dimension_numbers=("NCHW", "OIHW", "NCHW"))
        return y + b[None, :, None, None]
    w1, b1 = params["conv1"]
    w3, b3 = params["conv3"]
    w2, b2 = params["conv2"]
    x = jax.nn.relu(conv(x_nchw, w1, b1, 4))
    x = jax.nn.relu(conv(x, w3, b3, 2))
    return conv(x, w2, b2, 2)


if __name__ == "__main__":
    key = jax.random.PRNGKey(0)
    kp, kx = jax.random.split(key)

    input_channels, num_channels = 4, 8
    params = init_params(kp, input_channels, num_channels)
    fwd = jax.jit(functools.partial(error_calibration_module_large_kernel_forward,
                                    b_tile=8))

    # Primary check: the small spec shape (batch=2).
    x = jax.random.normal(kx, (2, input_channels, 16, 16), jnp.float32)
    out = jax.block_until_ready(fwd(params, x))
    ref = _reference_forward(params, x)
    np.testing.assert_allclose(np.asarray(out), np.asarray(ref),
                               rtol=2e-4, atol=2e-4)

    # Secondary check: exercises multi-step grid + batch-tile padding (12 -> 2 steps of 8).
    x2 = jax.random.normal(jax.random.PRNGKey(1), (12, input_channels, 16, 16),
                           jnp.float32)
    out2 = jax.block_until_ready(fwd(params, x2))
    ref2 = _reference_forward(params, x2)
    np.testing.assert_allclose(np.asarray(out2), np.asarray(ref2),
                               rtol=2e-4, atol=2e-4)

    print("KERNEL_OK")
</pallas_src>

<mosaic_0001>
module attributes {stable_mosaic.version = 11 : i64} {
  func.func @kernel(%arg0: i32, %arg1: memref<2x16x64xf32, #tpu.memory_space<vmem>>, %arg2: memref<576x128xf32, #tpu.memory_space<vmem>>, %arg3: memref<1x128xf32, #tpu.memory_space<vmem>>, %arg4: memref<640x64xf32, #tpu.memory_space<vmem>>, %arg5: memref<1x64xf32, #tpu.memory_space<vmem>>, %arg6: memref<320x64xf32, #tpu.memory_space<vmem>>, %arg7: memref<1x64xf32, #tpu.memory_space<vmem>>, %arg8: memref<2x16x64xf32, #tpu.memory_space<vmem>>, %arg9: memref<2x24x64xf32, #tpu.memory_space<vmem>>, %arg10: memref<2x20x128xf32, #tpu.memory_space<vmem>>, %arg11: memref<2x20x64xf32, #tpu.memory_space<vmem>>, %arg12: memref<32x576xf32, #tpu.memory_space<vmem>>, %arg13: memref<32x640xf32, #tpu.memory_space<vmem>>, %arg14: memref<32x320xf32, #tpu.memory_space<vmem>>) attributes {dimension_semantics = [#tpu.dimension_semantics<parallel>], iteration_bounds = array<i64: 1>, scalar_prefetch = 0 : i64, scratch_operands = 6 : i64, tpu.core_type = #tpu.core_type<tc>, window_params = [{transform_indices = @transform_0, window_bounds = array<i64: 2, 16, 64>}, {pipeline_mode = #tpu.pipeline_mode<synchronous>, transform_indices = @transform_1, window_bounds = array<i64: 576, 128>}, {pipeline_mode = #tpu.pipeline_mode<synchronous>, transform_indices = @transform_2, window_bounds = array<i64: 1, 128>}, {pipeline_mode = #tpu.pipeline_mode<synchronous>, transform_indices = @transform_3, window_bounds = array<i64: 640, 64>}, {pipeline_mode = #tpu.pipeline_mode<synchronous>, transform_indices = @transform_4, window_bounds = array<i64: 1, 64>}, {pipeline_mode = #tpu.pipeline_mode<synchronous>, transform_indices = @transform_5, window_bounds = array<i64: 320, 64>}, {pipeline_mode = #tpu.pipeline_mode<synchronous>, transform_indices = @transform_6, window_bounds = array<i64: 1, 64>}, {transform_indices = @transform_7, window_bounds = array<i64: 2, 16, 64>}]} {
    %cst = arith.constant 0.000000e+00 : f32
    %0 = vector.broadcast %cst : f32 to vector<2x4x64xf32>
    %c0 = arith.constant 0 : index
    %c0_0 = arith.constant 0 : index
    %c0_1 = arith.constant 0 : index
    %1 = vector.load %arg9[%c0, %c0_0, %c0_1] : memref<2x24x64xf32, #tpu.memory_space<vmem>>, vector<2x4x64xf32>
    tpu.vector_store %arg9[%c0, %c0_0, %c0_1], %0 {strides = array<i32>} : memref<2x24x64xf32, #tpu.memory_space<vmem>>, vector<2x4x64xf32>,
    %cst_2 = arith.constant 0.000000e+00 : f32
    %2 = vector.broadcast %cst_2 : f32 to vector<2x4x64xf32>
    %c0_3 = arith.constant 0 : index
    %c20 = arith.constant 20 : index
    %c0_4 = arith.constant 0 : index
    %3 = vector.load %arg9[%c0_3, %c20, %c0_4] : memref<2x24x64xf32, #tpu.memory_space<vmem>>, vector<2x4x64xf32>
    tpu.vector_store %arg9[%c0_3, %c20, %c0_4], %2 {strides = array<i32>} : memref<2x24x64xf32, #tpu.memory_space<vmem>>, vector<2x4x64xf32>,
    %c0_5 = arith.constant 0 : index
    %c0_6 = arith.constant 0 : index
    %c0_7 = arith.constant 0 : index
    %4 = vector.load %arg1[%c0_5, %c0_6, %c0_7] : memref<2x16x64xf32, #tpu.memory_space<vmem>>, vector<2x16x64xf32>
    %c0_8 = arith.constant 0 : index
    %c4 = arith.constant 4 : index
    %c0_9 = arith.constant 0 : index
    %5 = vector.load %arg9[%c0_8, %c4, %c0_9] : memref<2x24x64xf32, #tpu.memory_space<vmem>>, vector<2x16x64xf32>
    tpu.vector_store %arg9[%c0_8, %c4, %c0_9], %4 {strides = array<i32>} : memref<2x24x64xf32, #tpu.memory_space<vmem>>, vector<2x16x64xf32>,
    %c0_10 = arith.constant 0 : index
    %c0_11 = arith.constant 0 : index
    %c0_12 = arith.constant 0 : index
    %6 = vector.load %arg9[%c0_10, %c0_11, %c0_12] : memref<2x24x64xf32, #tpu.memory_space<vmem>>, vector<2x16x64xf32>
    %7 = vector.shape_cast %6 : vector<2x16x64xf32> to vector<32x64xf32>
    %c0_13 = arith.constant 0 : index
    %c0_14 = arith.constant 0 : index
    %8 = vector.load %arg12[%c0_13, %c0_14] : memref<32x576xf32, #tpu.memory_space<vmem>>, vector<32x64xf32>
    tpu.vector_store %arg12[%c0_13, %c0_14], %7 {strides = array<i32>} : memref<32x576xf32, #tpu.memory_space<vmem>>, vector<32x64xf32>,
    %c0_15 = arith.constant 0 : index
    %c1 = arith.constant 1 : index
    %c0_16 = arith.constant 0 : index
    %9 = vector.load %arg9[%c0_15, %c1, %c0_16] : memref<2x24x64xf32, #tpu.memory_space<vmem>>, vector<2x16x64xf32>
    %10 = vector.shape_cast %9 : vector<2x16x64xf32> to vector<32x64xf32>
    %c0_17 = arith.constant 0 : index
    %c64 = arith.constant 64 : index
    %11 = vector.load %arg12[%c0_17, %c64] : memref<32x576xf32, #tpu.memory_space<vmem>>, vector<32x64xf32>
    tpu.vector_store %arg12[%c0_17, %c64], %10 {strides = array<i32>} : memref<32x576xf32, #tpu.memory_space<vmem>>, vector<32x64xf32>,
    %c0_18 = arith.constant 0 : index
    %c2 = arith.constant 2 : index
    %c0_19 = arith.constant 0 : index
    %12 = vector.load %arg9[%c0_18, %c2, %c0_19] : memref<2x24x64xf32, #tpu.memory_space<vmem>>, vector<2x16x64xf32>
    %13 = vector.shape_cast %12 : vector<2x16x64xf32> to vector<32x64xf32>
    %c0_20 = arith.constant 0 : index
    %c128 = arith.constant 128 : index
    %14 = vector.load %arg12[%c0_20, %c128] : memref<32x576xf32, #tpu.memory_space<vmem>>, vector<32x64xf32>
    tpu.vector_store %arg12[%c0_20, %c128], %13 {strides = array<i32>} : memref<32x576xf32, #tpu.memory_space<vmem>>, vector<32x64xf32>,
    %c0_21 = arith.constant 0 : index
    %c3 = arith.constant 3 : index
    %c0_22 = arith.constant 0 : index
    %15 = vector.load %arg9[%c0_21, %c3, %c0_22] : memref<2x24x64xf32, #tpu.memory_space<vmem>>, vector<2x16x64xf32>
    %16 = vector.shape_cast %15 : vector<2x16x64xf32> to vector<32x64xf32>
    %c0_23 = arith.constant 0 : index
    %c192 = arith.constant 192 : index
    %17 = vector.load %arg12[%c0_23, %c192] : memref<32x576xf32, #tpu.memory_space<vmem>>, vector<32x64xf32>
    tpu.vector_store %arg12[%c0_23, %c192], %16 {strides = array<i32>} : memref<32x576xf32, #tpu.memory_space<vmem>>, vector<32x64xf32>,
    %c0_24 = arith.constant 0 : index
    %c4_25 = arith.constant 4 : index
    %c0_26 = arith.constant 0 : index
    %18 = vector.load %arg9[%c0_24, %c4_25, %c0_26] : memref<2x24x64xf32, #tpu.memory_space<vmem>>, vector<2x16x64xf32>
    %19 = vector.shape_cast %18 : vector<2x16x64xf32> to vector<32x64xf32>
    %c0_27 = arith.constant 0 : index
    %c256 = arith.constant 256 : index
    %20 = vector.load %arg12[%c0_27, %c256] : memref<32x576xf32, #tpu.memory_space<vmem>>, vector<32x64xf32>
    tpu.vector_store %arg12[%c0_27, %c256], %19 {strides = array<i32>} : memref<32x576xf32, #tpu.memory_space<vmem>>, vector<32x64xf32>,
    %c0_28 = arith.constant 0 : index
    %c5 = arith.constant 5 : index
    %c0_29 = arith.constant 0 : index
    %21 = vector.load %arg9[%c0_28, %c5, %c0_29] : memref<2x24x64xf32, #tpu.memory_space<vmem>>, vector<2x16x64xf32>
    %22 = vector.shape_cast %21 : vector<2x16x64xf32> to vector<32x64xf32>
    %c0_30 = arith.constant 0 : index
    %c320 = arith.constant 320 : index
    %23 = vector.load %arg12[%c0_30, %c320] : memref<32x576xf32, #tpu.memory_space<vmem>>, vector<32x64xf32>
    tpu.vector_store %arg12[%c0_30, %c320], %22 {strides = array<i32>} : memref<32x576xf32, #tpu.memory_space<vmem>>, vector<32x64xf32>,
    %c0_31 = arith.constant 0 : index
    %c6 = arith.constant 6 : index
    %c0_32 = arith.constant 0 : index
    %24 = vector.load %arg9[%c0_31, %c6, %c0_32] : memref<2x24x64xf32, #tpu.memory_space<vmem>>, vector<2x16x64xf32>
    %25 = vector.shape_cast %24 : vector<2x16x64xf32> to vector<32x64xf32>
    %c0_33 = arith.constant 0 : index
    %c384 = arith.constant 384 : index
    %26 = vector.load %arg12[%c0_33, %c384] : memref<32x576xf32, #tpu.memory_space<vmem>>, vector<32x64xf32>
    tpu.vector_store %arg12[%c0_33, %c384], %25 {strides = array<i32>} : memref<32x576xf32, #tpu.memory_space<vmem>>, vector<32x64xf32>,
    %c0_34 = arith.constant 0 : index
    %c7 = arith.constant 7 : index
    %c0_35 = arith.constant 0 : index
    %27 = vector.load %arg9[%c0_34, %c7, %c0_35] : memref<2x24x64xf32, #tpu.memory_space<vmem>>, vector<2x16x64xf32>
    %28 = vector.shape_cast %27 : vector<2x16x64xf32> to vector<32x64xf32>
    %c0_36 = arith.constant 0 : index
    %c448 = arith.constant 448 : index
    %29 = vector.load %arg12[%c0_36, %c448] : memref<32x576xf32, #tpu.memory_space<vmem>>, vector<32x64xf32>
    tpu.vector_store %arg12[%c0_36, %c448], %28 {strides = array<i32>} : memref<32x576xf32, #tpu.memory_space<vmem>>, vector<32x64xf32>,
    %c0_37 = arith.constant 0 : index
    %c8 = arith.constant 8 : index
    %c0_38 = arith.constant 0 : index
    %30 = vector.load %arg9[%c0_37, %c8, %c0_38] : memref<2x24x64xf32, #tpu.memory_space<vmem>>, vector<2x16x64xf32>
    %31 = vector.shape_cast %30 : vector<2x16x64xf32> to vector<32x64xf32>
    %c0_39 = arith.constant 0 : index
    %c512 = arith.constant 512 : index
    %32 = vector.load %arg12[%c0_39, %c512] : memref<32x576xf32, #tpu.memory_space<vmem>>, vector<32x64xf32>
    tpu.vector_store %arg12[%c0_39, %c512], %31 {strides = array<i32>} : memref<32x576xf32, #tpu.memory_space<vmem>>, vector<32x64xf32>,
    %c0_40 = arith.constant 0 : index
    %c0_41 = arith.constant 0 : index
    %33 = vector.load %arg12[%c0_40, %c0_41] : memref<32x576xf32, #tpu.memory_space<vmem>>, vector<32x576xf32>
    %c0_42 = arith.constant 0 : index
    %c0_43 = arith.constant 0 : index
    %34 = vector.load %arg2[%c0_42, %c0_43] : memref<576x128xf32, #tpu.memory_space<vmem>>, vector<576x128xf32>
    %cst_44 = arith.constant dense<0.000000e+00> : vector<32x128xf32>
    %35 = tpu.matmul %33, %34, %cst_44 {dimension_numbers = #tpu.dot_dimension_numbers<[1], [0], [0], [1], [0, 0, 1, 1], [], []>} : vector<32x576xf32>, vector<576x128xf32>, vector<32x128xf32> -> vector<32x128xf32>
    %c0_45 = arith.constant 0 : index
    %c0_46 = arith.constant 0 : index
    %36 = vector.load %arg3[%c0_45, %c0_46] : memref<1x128xf32, #tpu.memory_space<vmem>>, vector<1x128xf32>
    %37 = vector.broadcast %36 : vector<1x128xf32> to vector<32x128xf32>
    %38 = arith.addf %35, %37 : vector<32x128xf32>
    %cst_47 = arith.constant 0.000000e+00 : f32
    %39 = vector.broadcast %cst_47 : f32 to vector<32x128xf32>
    %40 = arith.maximumf %38, %39 : vector<32x128xf32>
    %cst_48 = arith.constant 0.000000e+00 : f32
    %41 = vector.broadcast %cst_48 : f32 to vector<2x2x128xf32>
    %c0_49 = arith.constant 0 : index
    %c0_50 = arith.constant 0 : index
    %c0_51 = arith.constant 0 : index
    %42 = vector.load %arg10[%c0_49, %c0_50, %c0_51] : memref<2x20x128xf32, #tpu.memory_space<vmem>>, vector<2x2x128xf32>
    tpu.vector_store %arg10[%c0_49, %c0_50, %c0_51], %41 {strides = array<i32>} : memref<2x20x128xf32, #tpu.memory_space<vmem>>, vector<2x2x128xf32>,
    %cst_52 = arith.constant 0.000000e+00 : f32
    %43 = vector.broadcast %cst_52 : f32 to vector<2x2x128xf32>
    %c0_53 = arith.constant 0 : index
    %c18 = arith.constant 18 : index
    %c0_54 = arith.constant 0 : index
    %44 = vector.load %arg10[%c0_53, %c18, %c0_54] : memref<2x20x128xf32, #tpu.memory_space<vmem>>, vector<2x2x128xf32>
    tpu.vector_store %arg10[%c0_53, %c18, %c0_54], %43 {strides = array<i32>} : memref<2x20x128xf32, #tpu.memory_space<vmem>>, vector<2x2x128xf32>,
    %45 = vector.shape_cast %40 : vector<32x128xf32> to vector<2x16x128xf32>
    %c0_55 = arith.constant 0 : index
    %c2_56 = arith.constant 2 : index
    %c0_57 = arith.constant 0 : index
    %46 = vector.load %arg10[%c0_55, %c2_56, %c0_57] : memref<2x20x128xf32, #tpu.memory_space<vmem>>, vector<2x16x128xf32>
    tpu.vector_store %arg10[%c0_55, %c2_56, %c0_57], %45 {strides = array<i32>} : memref<2x20x128xf32, #tpu.memory_space<vmem>>, vector<2x16x128xf32>,
    %c0_58 = arith.constant 0 : index
    %c0_59 = arith.constant 0 : index
    %c0_60 = arith.constant 0 : index
    %47 = vector.load %arg10[%c0_58, %c0_59, %c0_60] : memref<2x20x128xf32, #tpu.memory_space<vmem>>, vector<2x16x128xf32>
    %48 = vector.shape_cast %47 : vector<2x16x128xf32> to vector<32x128xf32>
    %c0_61 = arith.constant 0 : index
    %c0_62 = arith.constant 0 : index
    %49 = vector.load %arg13[%c0_61, %c0_62] : memref<32x640xf32, #tpu.memory_space<vmem>>, vector<32x128xf32>
    tpu.vector_store %arg13[%c0_61, %c0_62], %48 {strides = array<i32>} : memref<32x640xf32, #tpu.memory_space<vmem>>, vector<32x128xf32>,
    %c0_63 = arith.constant 0 : index
    %c1_64 = arith.constant 1 : index
    %c0_65 = arith.constant 0 : index
    %50 = vector.load %arg10[%c0_63, %c1_64, %c0_65] : memref<2x20x128xf32, #tpu.memory_space<vmem>>, vector<2x16x128xf32>
    %51 = vector.shape_cast %50 : vector<2x16x128xf32> to vector<32x128xf32>
    %c0_66 = arith.constant 0 : index
    %c128_67 = arith.constant 128 : index
    %52 = vector.load %arg13[%c0_66, %c128_67] : memref<32x640xf32, #tpu.memory_space<vmem>>, vector<32x128xf32>
    tpu.vector_store %arg13[%c0_66, %c128_67], %51 {strides = array<i32>} : memref<32x640xf32, #tpu.memory_space<vmem>>, vector<32x128xf32>,
    %c0_68 = arith.constant 0 : index
    %c2_69 = arith.constant 2 : index
    %c0_70 = arith.constant 0 : index
    %53 = vector.load %arg10[%c0_68, %c2_69, %c0_70] : memref<2x20x128xf32, #tpu.memory_space<vmem>>, vector<2x16x128xf32>
    %54 = vector.shape_cast %53 : vector<2x16x128xf32> to vector<32x128xf32>
    %c0_71 = arith.constant 0 : index
    %c256_72 = arith.constant 256 : index
    %55 = vector.load %arg13[%c0_71, %c256_72] : memref<32x640xf32, #tpu.memory_space<vmem>>, vector<32x128xf32>
    tpu.vector_store %arg13[%c0_71, %c256_72], %54 {strides = array<i32>} : memref<32x640xf32, #tpu.memory_space<vmem>>, vector<32x128xf32>,
    %c0_73 = arith.constant 0 : index
    %c3_74 = arith.constant 3 : index
    %c0_75 = arith.constant 0 : index
    %56 = vector.load %arg10[%c0_73, %c3_74, %c0_75] : memref<2x20x128xf32, #tpu.memory_space<vmem>>, vector<2x16x128xf32>
    %57 = vector.shape_cast %56 : vector<2x16x128xf32> to vector<32x128xf32>
    %c0_76 = arith.constant 0 : index
    %c384_77 = arith.constant 384 : index
    %58 = vector.load %arg13[%c0_76, %c384_77] : memref<32x640xf32, #tpu.memory_space<vmem>>, vector<32x128xf32>
    tpu.vector_store %arg13[%c0_76, %c384_77], %57 {strides = array<i32>} : memref<32x640xf32, #tpu.memory_space<vmem>>, vector<32x128xf32>,
    %c0_78 = arith.constant 0 : index
    %c4_79 = arith.constant 4 : index
    %c0_80 = arith.constant 0 : index
    %59 = vector.load %arg10[%c0_78, %c4_79, %c0_80] : memref<2x20x128xf32, #tpu.memory_space<vmem>>, vector<2x16x128xf32>
    %60 = vector.shape_cast %59 : vector<2x16x128xf32> to vector<32x128xf32>
    %c0_81 = arith.constant 0 : index
    %c512_82 = arith.constant 512 : index
    %61 = vector.load %arg13[%c0_81, %c512_82] : memref<32x640xf32, #tpu.memory_space<vmem>>, vector<32x128xf32>
    tpu.vector_store %arg13[%c0_81, %c512_82], %60 {strides = array<i32>} : memref<32x640xf32, #tpu.memory_space<vmem>>, vector<32x128xf32>,
    %c0_83 = arith.constant 0 : index
    %c0_84 = arith.constant 0 : index
    %62 = vector.load %arg13[%c0_83, %c0_84] : memref<32x640xf32, #tpu.memory_space<vmem>>, vector<32x640xf32>
    %c0_85 = arith.constant 0 : index
    %c0_86 = arith.constant 0 : index
    %63 = vector.load %arg4[%c0_85, %c0_86] : memref<640x64xf32, #tpu.memory_space<vmem>>, vector<640x64xf32>
    %cst_87 = arith.constant dense<0.000000e+00> : vector<32x64xf32>
    %64 = tpu.matmul %62, %63, %cst_87 {dimension_numbers = #tpu.dot_dimension_numbers<[1], [0], [0], [1], [0, 0, 1, 1], [], []>} : vector<32x640xf32>, vector<640x64xf32>, vector<32x64xf32> -> vector<32x64xf32>
    %c0_88 = arith.constant 0 : index
    %c0_89 = arith.constant 0 : index
    %65 = vector.load %arg5[%c0_88, %c0_89] : memref<1x64xf32, #tpu.memory_space<vmem>>, vector<1x64xf32>
    %66 = vector.broadcast %65 : vector<1x64xf32> to vector<32x64xf32>
    %67 = arith.addf %64, %66 : vector<32x64xf32>
    %cst_90 = arith.constant 0.000000e+00 : f32
    %68 = vector.broadcast %cst_90 : f32 to vector<32x64xf32>
    %69 = arith.maximumf %67, %68 : vector<32x64xf32>
    %cst_91 = arith.constant 0.000000e+00 : f32
    %70 = vector.broadcast %cst_91 : f32 to vector<2x2x64xf32>
    %c0_92 = arith.constant 0 : index
    %c0_93 = arith.constant 0 : index
    %c0_94 = arith.constant 0 : index
    %71 = vector.load %arg11[%c0_92, %c0_93, %c0_94] : memref<2x20x64xf32, #tpu.memory_space<vmem>>, vector<2x2x64xf32>
    tpu.vector_store %arg11[%c0_92, %c0_93, %c0_94], %70 {strides = array<i32>} : memref<2x20x64xf32, #tpu.memory_space<vmem>>, vector<2x2x64xf32>,
    %cst_95 = arith.constant 0.000000e+00 : f32
    %72 = vector.broadcast %cst_95 : f32 to vector<2x2x64xf32>
    %c0_96 = arith.constant 0 : index
    %c18_97 = arith.constant 18 : index
    %c0_98 = arith.constant 0 : index
    %73 = vector.load %arg11[%c0_96, %c18_97, %c0_98] : memref<2x20x64xf32, #tpu.memory_space<vmem>>, vector<2x2x64xf32>
    tpu.vector_store %arg11[%c0_96, %c18_97, %c0_98], %72 {strides = array<i32>} : memref<2x20x64xf32, #tpu.memory_space<vmem>>, vector<2x2x64xf32>,
    %74 = vector.shape_cast %69 : vector<32x64xf32> to vector<2x16x64xf32>
    %c0_99 = arith.constant 0 : index
    %c2_100 = arith.constant 2 : index
    %c0_101 = arith.constant 0 : index
    %75 = vector.load %arg11[%c0_99, %c2_100, %c0_101] : memref<2x20x64xf32, #tpu.memory_space<vmem>>, vector<2x16x64xf32>
    tpu.vector_store %arg11[%c0_99, %c2_100, %c0_101], %74 {strides = array<i32>} : memref<2x20x64xf32, #tpu.memory_space<vmem>>, vector<2x16x64xf32>,
    %c0_102 = arith.constant 0 : index
    %c0_103 = arith.constant 0 : index
    %c0_104 = arith.constant 0 : index
    %76 = vector.load %arg11[%c0_102, %c0_103, %c0_104] : memref<2x20x64xf32, #tpu.memory_space<vmem>>, vector<2x16x64xf32>
    %77 = vector.shape_cast %76 : vector<2x16x64xf32> to vector<32x64xf32>
    %c0_105 = arith.constant 0 : index
    %c0_106 = arith.constant 0 : index
    %78 = vector.load %arg14[%c0_105, %c0_106] : memref<32x320xf32, #tpu.memory_space<vmem>>, vector<32x64xf32>
    tpu.vector_store %arg14[%c0_105, %c0_106], %77 {strides = array<i32>} : memref<32x320xf32, #tpu.memory_space<vmem>>, vector<32x64xf32>,
    %c0_107 = arith.constant 0 : index
    %c1_108 = arith.constant 1 : index
    %c0_109 = arith.constant 0 : index
    %79 = vector.load %arg11[%c0_107, %c1_108, %c0_109] : memref<2x20x64xf32, #tpu.memory_space<vmem>>, vector<2x16x64xf32>
    %80 = vector.shape_cast %79 : vector<2x16x64xf32> to vector<32x64xf32>
    %c0_110 = arith.constant 0 : index
    %c64_111 = arith.constant 64 : index
    %81 = vector.load %arg14[%c0_110, %c64_111] : memref<32x320xf32, #tpu.memory_space<vmem>>, vector<32x64xf32>
    tpu.vector_store %arg14[%c0_110, %c64_111], %80 {strides = array<i32>} : memref<32x320xf32, #tpu.memory_space<vmem>>, vector<32x64xf32>,
    %c0_112 = arith.constant 0 : index
    %c2_113 = arith.constant 2 : index
    %c0_114 = arith.constant 0 : index
    %82 = vector.load %arg11[%c0_112, %c2_113, %c0_114] : memref<2x20x64xf32, #tpu.memory_space<vmem>>, vector<2x16x64xf32>
    %83 = vector.shape_cast %82 : vector<2x16x64xf32> to vector<32x64xf32>
    %c0_115 = arith.constant 0 : index
    %c128_116 = arith.constant 128 : index
    %84 = vector.load %arg14[%c0_115, %c128_116] : memref<32x320xf32, #tpu.memory_space<vmem>>, vector<32x64xf32>
    tpu.vector_store %arg14[%c0_115, %c128_116], %83 {strides = array<i32>} : memref<32x320xf32, #tpu.memory_space<vmem>>, vector<32x64xf32>,
    %c0_117 = arith.constant 0 : index
    %c3_118 = arith.constant 3 : index
    %c0_119 = arith.constant 0 : index
    %85 = vector.load %arg11[%c0_117, %c3_118, %c0_119] : memref<2x20x64xf32, #tpu.memory_space<vmem>>, vector<2x16x64xf32>
    %86 = vector.shape_cast %85 : vector<2x16x64xf32> to vector<32x64xf32>
    %c0_120 = arith.constant 0 : index
    %c192_121 = arith.constant 192 : index
    %87 = vector.load %arg14[%c0_120, %c192_121] : memref<32x320xf32, #tpu.memory_space<vmem>>, vector<32x64xf32>
    tpu.vector_store %arg14[%c0_120, %c192_121], %86 {strides = array<i32>} : memref<32x320xf32, #tpu.memory_space<vmem>>, vector<32x64xf32>,
    %c0_122 = arith.constant 0 : index
    %c4_123 = arith.constant 4 : index
    %c0_124 = arith.constant 0 : index
    %88 = vector.load %arg11[%c0_122, %c4_123, %c0_124] : memref<2x20x64xf32, #tpu.memory_space<vmem>>, vector<2x16x64xf32>
    %89 = vector.shape_cast %88 : vector<2x16x64xf32> to vector<32x64xf32>
    %c0_125 = arith.constant 0 : index
    %c256_126 = arith.constant 256 : index
    %90 = vector.load %arg14[%c0_125, %c256_126] : memref<32x320xf32, #tpu.memory_space<vmem>>, vector<32x64xf32>
    tpu.vector_store %arg14[%c0_125, %c256_126], %89 {strides = array<i32>} : memref<32x320xf32, #tpu.memory_space<vmem>>, vector<32x64xf32>,
    %c0_127 = arith.constant 0 : index
    %c0_128 = arith.constant 0 : index
    %91 = vector.load %arg14[%c0_127, %c0_128] : memref<32x320xf32, #tpu.memory_space<vmem>>, vector<32x320xf32>
    %c0_129 = arith.constant 0 : index
    %c0_130 = arith.constant 0 : index
    %92 = vector.load %arg6[%c0_129, %c0_130] : memref<320x64xf32, #tpu.memory_space<vmem>>, vector<320x64xf32>
    %cst_131 = arith.constant dense<0.000000e+00> : vector<32x64xf32>
    %93 = tpu.matmul %91, %92, %cst_131 {dimension_numbers = #tpu.dot_dimension_numbers<[1], [0], [0], [1], [0, 0, 1, 1], [], []>} : vector<32x320xf32>, vector<320x64xf32>, vector<32x64xf32> -> vector<32x64xf32>
    %c0_132 = arith.constant 0 : index
    %c0_133 = arith.constant 0 : index
    %94 = vector.load %arg7[%c0_132, %c0_133] : memref<1x64xf32, #tpu.memory_space<vmem>>, vector<1x64xf32>
    %95 = vector.broadcast %94 : vector<1x64xf32> to vector<32x64xf32>
    %96 = arith.addf %93, %95 : vector<32x64xf32>
    %97 = vector.shape_cast %96 : vector<32x64xf32> to vector<2x16x64xf32>
    %c0_134 = arith.constant 0 : index
    %c0_135 = arith.constant 0 : index
    %c0_136 = arith.constant 0 : index
    %98 = vector.load %arg8[%c0_134, %c0_135, %c0_136] : memref<2x16x64xf32, #tpu.memory_space<vmem>>, vector<2x16x64xf32>
    tpu.vector_store %arg8[%c0_134, %c0_135, %c0_136], %97 {strides = array<i32>} : memref<2x16x64xf32, #tpu.memory_space<vmem>>, vector<2x16x64xf32>,
    return
  }
  func.func @transform_0(%arg0: i32) -> (i32, i32, i32) {
    %c0_i32 = arith.constant 0 : i32
    %c0_i32_0 = arith.constant 0 : i32
    %c0_i32_1 = arith.constant 0 : i32
    return %arg0, %c0_i32, %c0_i32_0 : i32, i32, i32
  }
  func.func @transform_1(%arg0: i32) -> (i32, i32) {
    %c0_i32 = arith.constant 0 : i32
    %c0_i32_0 = arith.constant 0 : i32
    %c0_i32_1 = arith.constant 0 : i32
    return %c0_i32, %c0_i32_0 : i32, i32
  }
  func.func @transform_2(%arg0: i32) -> (i32, i32) {
    %c0_i32 = arith.constant 0 : i32
    %c0_i32_0 = arith.constant 0 : i32
    %c0_i32_1 = arith.constant 0 : i32
    return %c0_i32, %c0_i32_0 : i32, i32
  }
  func.func @transform_3(%arg0: i32) -> (i32, i32) {
    %c0_i32 = arith.constant 0 : i32
    %c0_i32_0 = arith.constant 0 : i32
    %c0_i32_1 = arith.constant 0 : i32
    return %c0_i32, %c0_i32_0 : i32, i32
  }
  func.func @transform_4(%arg0: i32) -> (i32, i32) {
    %c0_i32 = arith.constant 0 : i32
    %c0_i32_0 = arith.constant 0 : i32
    %c0_i32_1 = arith.constant 0 : i32
    return %c0_i32, %c0_i32_0 : i32, i32
  }
  func.func @transform_5(%arg0: i32) -> (i32, i32) {
    %c0_i32 = arith.constant 0 : i32
    %c0_i32_0 = arith.constant 0 : i32
    %c0_i32_1 = arith.constant 0 : i32
    return %c0_i32, %c0_i32_0 : i32, i32
  }
  func.func @transform_6(%arg0: i32) -> (i32, i32) {
    %c0_i32 = arith.constant 0 : i32
    %c0_i32_0 = arith.constant 0 : i32
    %c0_i32_1 = arith.constant 0 : i32
    return %c0_i32, %c0_i32_0 : i32, i32
  }
  func.func @transform_7(%arg0: i32) -> (i32, i32, i32) {
    %c0_i32 = arith.constant 0 : i32
    %c0_i32_0 = arith.constant 0 : i32
    %c0_i32_1 = arith.constant 0 : i32
    return %arg0, %c0_i32, %c0_i32_0 : i32, i32, i32
  }
}

</mosaic_0001>

<bundles_post_ra>
// kernel: tile.18
= control target key start
LH: loop header
LB: loop body
LE: loop exit
PB: predicated region body
PF: predicated region fallthrough
CT: control target
= control target key end

     0   :  { %s28_s0 = inlined_call_operand.vmem [shape: f32[8], index: 0, kind: input, shape index: {}]   ;;  %s29_s1 = inlined_call_operand.vmem [shape: f32[16,8], index: 1, kind: output, shape index: {}]  }
   0x1   :  { %v4_v0 = vld [vmem:[%s28_s0] ss:$0 sm:$0xff] }
   0x2   :  { %5 = vst [vmem:[%s29_s1] sm:$0xff] %v4_v0  ;;  %8 = vst [vmem:[%s29_s1 + $0x8] sm:$0xff] %v4_v0 }

// kernel: tile.19
= control target key start
LH: loop header
LB: loop body
LE: loop exit
PB: predicated region body
PF: predicated region fallthrough
CT: control target
= control target key end

     0   :  { %s131_s10 = smov 120   ;;  %s132_s11 = smov 104   ;;  %vm3_vm0 = vcmask 64512   ;;  %vm9_vm1 = vcmask 1048512   ;;  %vm15_vm2 = vcmask 982912   ;;  %vm21_vm3 = vcmask 917312   ;;  %s207_s0 = inlined_call_operand.vmem [shape: f32[16,8], index: 0, kind: input, shape index: {}]   ;;  %s208_s1 = inlined_call_operand.vmem [shape: f32[1,128], index: 1, kind: output, shape index: {}]  }
   0x1   :  { %v101_v0 = vld [vmem:[%s207_s0 + $0xf] sm:$0x1]   ;;  %v103_v1 = vld [vmem:[%s207_s0 + $0xd] sm:$0x1]   ;;  %v102_v2 = vld [vmem:[%s207_s0 + $0xe] sm:$0x1]  }
   0x2   :  { %7 = vrot.lane.b32.xlu0 %v101_v0, %s131_s10  ;;  %19 = vrot.lane.b32.xlu1 %v103_v1, %s132_s11  ;;  %v104_v3 = vld [vmem:[%s207_s0 + $0xc] sm:$0x1]   ;;  %s133_s16 = smov 112   ;;  %s134_s17 = smov 96   ;;  %v105_v4 = vld [vmem:[%s207_s0 + $0xb] sm:$0x1]  }
   0x3   :  { %v106_v5 = vld [vmem:[%s207_s0 + $0xa] sm:$0x1]   ;;  %v2_v6 = vld [vmem:[%s207_s0] sm:$0x1]   ;;  %s135_s24 = smov 88   ;;  %s136_s25 = smov 80  }
   0x4   :  { %4 = vst.msk [vmem:[#allocation0] sm:$0x1] %vm3_vm0, %v2_v6   ;;  %v107_v7 = vld [vmem:[%s207_s0 + $0x9] sm:$0x1]   ;;  %v108_v8 = vld [vmem:[%s207_s0 + $0x8] sm:$0x1]  }
   0x5   :  { %s137_s30 = smov 72   ;;  %s138_s2 = smov 64   ;;  %v109_v9 = vld [vmem:[%s207_s0 + $0x7] sm:$0x1]   ;;  %v110_v10 = vld [vmem:[%s207_s0 + $0x6] sm:$0x1]  }
   0x6   :  { %13 = vrot.lane.b32.xlu0 %v102_v2, %s133_s16  ;;  %25 = vrot.lane.b32.xlu1 %v104_v3, %s134_s17  ;;  %s139_s7 = smov 56   ;;  %s140_s8 = smov 48   ;;  %v111_v11 = vld [vmem:[%s207_s0 + $0x5] sm:$0x1]   ;;  %v112_v12 = vld [vmem:[%s207_s0 + $0x4] sm:$0x1]  }
   0x7   :  { %s141_s13 = smov 40   ;;  %s142_s14 = smov 32   ;;  %v113_v13 = vld [vmem:[%s207_s0 + $0x3] sm:$0x1]   ;;  %v114_v14 = vld [vmem:[%s207_s0 + $0x2] sm:$0x1]  }
   0x8   :  { %s143_s19 = smov 24   ;;  %s144_s20 = smov 16   ;;  %v115_v15 = vld [vmem:[%s207_s0 + $0x1] sm:$0x1]   ;;  %vm27_vm4 = vcmask 851712   ;;  %vm33_vm5 = vcmask 786112  }
   0x9   :  { %s145_s0 = smov 8   ;;  %vm39_vm6 = vcmask 720512   ;;  %vm45_vm7 = vcmask 654912   ;;  %vm51_vm8 = vcmask 589312   ;;  %vm57_vm9 = vcmask 523712  }
   0xa   :  { %31 = vrot.lane.b32.xlu0 %v105_v4, %s135_s24  ;;  %37 = vrot.lane.b32.xlu1 %v106_v5, %s136_s25  ;;  %vm63_vm10 = vcmask 458112   ;;  %vm69_vm11 = vcmask 392512   ;;  %vm75_vm12 = vcmask 326912   ;;  %vm81_vm13 = vcmask 261312  }
   0xb   :  { %vm87_vm14 = vcmask 195712   ;;  %vm93_vm15 = vcmask 130112  }
   0xe   :  { %43 = vrot.lane.b32.xlu0 %v107_v7, %s137_s30  ;;  %49 = vrot.lane.b32.xlu1 %v108_v8, %s138_s2 }
  0x12   :  { %55 = vrot.lane.b32.xlu0 %v109_v9, %s139_s7  ;;  %61 = vrot.lane.b32.xlu1 %v110_v10, %s140_s8 }
  0x16   :  { %67 = vrot.lane.b32.xlu0 %v111_v11, %s141_s13  ;;  %73 = vrot.lane.b32.xlu1 %v112_v12, %s142_s14 }
  0x1a   :  { %79 = vrot.lane.b32.xlu0 %v113_v13, %s143_s19  ;;  %85 = vrot.lane.b32.xlu1 %v114_v14, %s144_s20 }
  0x1e   :  { %91 = vrot.lane.b32.xlu0 %v115_v15, %s145_s0 }
  0x74   :  { %v8_v16 = vpop.permute.xlu0 %7   ;;  %v20_v17 = vpop.permute.xlu1 %19  }
  0x75   :  { %10 = vst.msk [vmem:[#allocation0] sm:$0x1] %vm9_vm1, %v8_v16  }
  0x78   :  { %v14_v18 = vpop.permute.xlu0 %13   ;;  %v26_v19 = vpop.permute.xlu1 %25  }
  0x79   :  { %16 = vst.msk [vmem:[#allocation0] sm:$0x1] %vm15_vm2, %v14_v18  }
  0x7a   :  { %22 = vst.msk [vmem:[#allocation0] sm:$0x1] %vm21_vm3, %v20_v17  }
  0x7b   :  { %28 = vst.msk [vmem:[#allocation0] sm:$0x1] %vm27_vm4, %v26_v19  }
  0x7c   :  { %v32_v20 = vpop.permute.xlu0 %31   ;;  %v38_v21 = vpop.permute.xlu1 %37  }
  0x7d   :  { %34 = vst.msk [vmem:[#allocation0] sm:$0x1] %vm33_vm5, %v32_v20  }
  0x7e   :  { %40 = vst.msk [vmem:[#allocation0] sm:$0x1] %vm39_vm6, %v38_v21  }
  0x80   :  { %v44_v22 = vpop.permute.xlu0 %43   ;;  %v50_v23 = vpop.permute.xlu1 %49  }
  0x81   :  { %46 = vst.msk [vmem:[#allocation0] sm:$0x1] %vm45_vm7, %v44_v22  }
  0x82   :  { %52 = vst.msk [vmem:[#allocation0] sm:$0x1] %vm51_vm8, %v50_v23  }
  0x84   :  { %v56_v24 = vpop.permute.xlu0 %55   ;;  %v62_v25 = vpop.permute.xlu1 %61  }
  0x85   :  { %58 = vst.msk [vmem:[#allocation0] sm:$0x1] %vm57_vm9, %v56_v24  }
  0x86   :  { %64 = vst.msk [vmem:[#allocation0] sm:$0x1] %vm63_vm10, %v62_v25  }
  0x88   :  { %v68_v26 = vpop.permute.xlu0 %67   ;;  %v74_v27 = vpop.permute.xlu1 %73  }
  0x89   :  { %70 = vst.msk [vmem:[#allocation0] sm:$0x1] %vm69_vm11, %v68_v26  }
  0x8a   :  { %76 = vst.msk [vmem:[#allocation0] sm:$0x1] %vm75_vm12, %v74_v27  }
  0x8c   :  { %v80_v28 = vpop.permute.xlu0 %79   ;;  %v86_v29 = vpop.permute.xlu1 %85  }
  0x8d   :  { %82 = vst.msk [vmem:[#allocation0] sm:$0x1] %vm81_vm13, %v80_v28  }
  0x8e   :  { %88 = vst.msk [vmem:[#allocation0] sm:$0x1] %vm87_vm14, %v86_v29  }
  0x90   :  { %v92_v30 = vpop.permute.xlu0 %91  }
  0x91   :  { %94 = vst.msk [vmem:[#allocation0] sm:$0x1] %vm93_vm15, %v92_v30  }
  0x98   :  { %v98_v31 = vld [vmem:[#allocation0] sm:$0x1] }
  0x99   :  { %100 = vst [vmem:[%s208_s1] sm:$0x1] %v98_v31 }

// kernel: tile.23
= control target key start
LH: loop header
LB: loop body
LE: loop exit
PB: predicated region body
PF: predicated region fallthrough
CT: control target
= control target key end

     0   :  { %s28_s0 = inlined_call_operand.vmem [shape: f32[4], index: 0, kind: input, shape index: {}]   ;;  %s29_s1 = inlined_call_operand.vmem [shape: f32[16,4], index: 1, kind: output, shape index: {}]  }
   0x1   :  { %v4_v0 = vld [vmem:[%s28_s0] ss:$0 sm:$0xff] }
   0x2   :  { %5 = vst [vmem:[%s29_s1] sm:$0xff] %v4_v0  ;;  %8 = vst [vmem:[%s29_s1 + $0x8] sm:$0xff] %v4_v0 }

// kernel: tile.24
= control target key start
LH: loop header
LB: loop body
LE: loop exit
PB: predicated region body
PF: predicated region fallthrough
CT: control target
= control target key end

     0   :  { %s131_s10 = smov 60   ;;  %s132_s11 = smov 52   ;;  %vm3_vm0 = vcmask 31744   ;;  %vm9_vm1 = vcmask 523744   ;;  %vm15_vm2 = vcmask 490944   ;;  %vm21_vm3 = vcmask 458144   ;;  %s207_s0 = inlined_call_operand.vmem [shape: f32[16,4], index: 0, kind: input, shape index: {}]   ;;  %s208_s1 = inlined_call_operand.vmem [shape: f32[1,64], index: 1, kind: output, shape index: {}]  }
   0x1   :  { %v101_v0 = vld [vmem:[%s207_s0 + $0xf] sm:$0x1]   ;;  %v103_v1 = vld [vmem:[%s207_s0 + $0xd] sm:$0x1]   ;;  %v102_v2 = vld [vmem:[%s207_s0 + $0xe] sm:$0x1]  }
   0x2   :  { %7 = vrot.lane.b32.xlu0 %v101_v0, %s131_s10  ;;  %19 = vrot.lane.b32.xlu1 %v103_v1, %s132_s11  ;;  %v104_v3 = vld [vmem:[%s207_s0 + $0xc] sm:$0x1]   ;;  %s133_s16 = smov 56   ;;  %s134_s17 = smov 48   ;;  %v105_v4 = vld [vmem:[%s207_s0 + $0xb] sm:$0x1]  }
   0x3   :  { %v106_v5 = vld [vmem:[%s207_s0 + $0xa] sm:$0x1]   ;;  %v2_v6 = vld [vmem:[%s207_s0] sm:$0x1]   ;;  %s135_s24 = smov 44   ;;  %s136_s25 = smov 40  }
   0x4   :  { %4 = vst.msk [vmem:[#allocation0] sm:$0x1] %vm3_vm0, %v2_v6   ;;  %v107_v7 = vld [vmem:[%s207_s0 + $0x9] sm:$0x1]   ;;  %v108_v8 = vld [vmem:[%s207_s0 + $0x8] sm:$0x1]  }
   0x5   :  { %s137_s30 = smov 36   ;;  %s138_s2 = smov 32   ;;  %v109_v9 = vld [vmem:[%s207_s0 + $0x7] sm:$0x1]   ;;  %v110_v10 = vld [vmem:[%s207_s0 + $0x6] sm:$0x1]  }
   0x6   :  { %13 = vrot.lane.b32.xlu0 %v102_v2, %s133_s16  ;;  %25 = vrot.lane.b32.xlu1 %v104_v3, %s134_s17  ;;  %s139_s7 = smov 28   ;;  %s140_s8 = smov 24   ;;  %v111_v11 = vld [vmem:[%s207_s0 + $0x5] sm:$0x1]   ;;  %v112_v12 = vld [vmem:[%s207_s0 + $0x4] sm:$0x1]  }
   0x7   :  { %s141_s13 = smov 20   ;;  %s142_s14 = smov 16   ;;  %v113_v13 = vld [vmem:[%s207_s0 + $0x3] sm:$0x1]   ;;  %v114_v14 = vld [vmem:[%s207_s0 + $0x2] sm:$0x1]  }
   0x8   :  { %s143_s19 = smov 12   ;;  %s144_s20 = smov 8   ;;  %v115_v15 = vld [vmem:[%s207_s0 + $0x1] sm:$0x1]   ;;  %vm27_vm4 = vcmask 425344   ;;  %vm33_vm5 = vcmask 392544  }
   0x9   :  { %s145_s0 = smov 4   ;;  %vm39_vm6 = vcmask 359744   ;;  %vm45_vm7 = vcmask 326944   ;;  %vm51_vm8 = vcmask 294144   ;;  %vm57_vm9 = vcmask 261344  }
   0xa   :  { %31 = vrot.lane.b32.xlu0 %v105_v4, %s135_s24  ;;  %37 = vrot.lane.b32.xlu1 %v106_v5, %s136_s25  ;;  %vm63_vm10 = vcmask 228544   ;;  %vm69_vm11 = vcmask 195744   ;;  %vm75_vm12 = vcmask 162944   ;;  %vm81_vm13 = vcmask 130144  }
   0xb   :  { %vm87_vm14 = vcmask 97344   ;;  %vm93_vm15 = vcmask 64544  }
   0xe   :  { %43 = vrot.lane.b32.xlu0 %v107_v7, %s137_s30  ;;  %49 = vrot.lane.b32.xlu1 %v108_v8, %s138_s2 }
  0x12   :  { %55 = vrot.lane.b32.xlu0 %v109_v9, %s139_s7  ;;  %61 = vrot.lane.b32.xlu1 %v110_v10, %s140_s8 }
  0x16   :  { %67 = vrot.lane.b32.xlu0 %v111_v11, %s141_s13  ;;  %73 = vrot.lane.b32.xlu1 %v112_v12, %s142_s14 }
  0x1a   :  { %79 = vrot.lane.b32.xlu0 %v113_v13, %s143_s19  ;;  %85 = vrot.lane.b32.xlu1 %v114_v14, %s144_s20 }
  0x1e   :  { %91 = vrot.lane.b32.xlu0 %v115_v15, %s145_s0 }
  0x74   :  { %v8_v16 = vpop.permute.xlu0 %7   ;;  %v20_v17 = vpop.permute.xlu1 %19  }
  0x75   :  { %10 = vst.msk [vmem:[#allocation0] sm:$0x1] %vm9_vm1, %v8_v16  }
  0x78   :  { %v14_v18 = vpop.permute.xlu0 %13   ;;  %v26_v19 = vpop.permute.xlu1 %25  }
  0x79   :  { %16 = vst.msk [vmem:[#allocation0] sm:$0x1] %vm15_vm2, %v14_v18  }
  0x7a   :  { %22 = vst.msk [vmem:[#allocation0] sm:$0x1] %vm21_vm3, %v20_v17  }
  0x7b   :  { %28 = vst.msk [vmem:[#allocation0] sm:$0x1] %vm27_vm4, %v26_v19  }
  0x7c   :  { %v32_v20 = vpop.permute.xlu0 %31   ;;  %v38_v21 = vpop.permute.xlu1 %37  }
  0x7d   :  { %34 = vst.msk [vmem:[#allocation0] sm:$0x1] %vm33_vm5, %v32_v20  }
  0x7e   :  { %40 = vst.msk [vmem:[#allocation0] sm:$0x1] %vm39_vm6, %v38_v21  }
  0x80   :  { %v44_v22 = vpop.permute.xlu0 %43   ;;  %v50_v23 = vpop.permute.xlu1 %49  }
  0x81   :  { %46 = vst.msk [vmem:[#allocation0] sm:$0x1] %vm45_vm7, %v44_v22  }
  0x82   :  { %52 = vst.msk [vmem:[#allocation0] sm:$0x1] %vm51_vm8, %v50_v23  }
  0x84   :  { %v56_v24 = vpop.permute.xlu0 %55   ;;  %v62_v25 = vpop.permute.xlu1 %61  }
  0x85   :  { %58 = vst.msk [vmem:[#allocation0] sm:$0x1] %vm57_vm9, %v56_v24  }
  0x86   :  { %64 = vst.msk [vmem:[#allocation0] sm:$0x1] %vm63_vm10, %v62_v25  }
  0x88   :  { %v68_v26 = vpop.permute.xlu0 %67   ;;  %v74_v27 = vpop.permute.xlu1 %73  }
  0x89   :  { %70 = vst.msk [vmem:[#allocation0] sm:$0x1] %vm69_vm11, %v68_v26  }
  0x8a   :  { %76 = vst.msk [vmem:[#allocation0] sm:$0x1] %vm75_vm12, %v74_v27  }
  0x8c   :  { %v80_v28 = vpop.permute.xlu0 %79   ;;  %v86_v29 = vpop.permute.xlu1 %85  }
  0x8d   :  { %82 = vst.msk [vmem:[#allocation0] sm:$0x1] %vm81_vm13, %v80_v28  }
  0x8e   :  { %88 = vst.msk [vmem:[#allocation0] sm:$0x1] %vm87_vm14, %v86_v29  }
  0x90   :  { %v92_v30 = vpop.permute.xlu0 %91  }
  0x91   :  { %94 = vst.msk [vmem:[#allocation0] sm:$0x1] %vm93_vm15, %v92_v30  }
  0x98   :  { %v98_v31 = vld [vmem:[#allocation0] sm:$0x1] }
  0x99   :  { %100 = vst [vmem:[%s208_s1] sm:$0x1] %v98_v31 }

// kernel: error_calibration_module_large_kernel_forward.1
= control target key start
LH: loop header
LB: loop body
LE: loop exit
PB: predicated region body
PF: predicated region fallthrough
CT: control target
= control target key end

     0   :  { %vm35_vm0 = vcmask 523264   ;;  %vm26_vm1 = vcmask 519168   ;;  %v1874_v2 = vmov 0.0   ;;  %s1875_s20 = smov 64   ;;  %vm68_vm2 = vcmask 1048064   ;;  %s2645_s0 = inlined_call_operand.vmem [shape: f32[2,16,64], index: 0, kind: input, shape index: {}]   ;;  %s2646_s1 = inlined_call_operand.vmem [shape: f32[576,128], index: 1, kind: input, shape index: {}]   ;;  %s2647_s3 = inlined_call_operand.vmem [shape: f32[640,64], index: 3, kind: input, shape index: {}]   ;;  %s2648_s2 = inlined_call_operand.vmem [shape: f32[1,128], index: 2, kind: input, shape index: {}]   ;;  %s2649_s5 = inlined_call_operand.vmem [shape: f32[320,64], index: 5, kind: input, shape index: {}]   ;;  %s2650_s4 = inlined_call_operand.vmem [shape: f32[1,64], index: 4, kind: input, shape index: {}]   ;;  %s2651_s6 = inlined_call_operand.vmem [shape: f32[1,64], index: 6, kind: input, shape index: {}]   ;;  %s2652_s7 = inlined_call_operand.vmem [shape: f32[2,16,64], index: 7, kind: output, shape index: {}]  }
   0x1   :  { %v31_v0 = vld [vmem:[%s2645_s0] sm:$0xff]  ;;  %v32_v1 = vld [vmem:[%s2645_s0 + $0x8] sm:$0xff]  ;;  %27 = vst.msk [vmem:[#allocation2] sm:$0xf] %vm26_vm1, %v1874_v2  ;;  %28 = vst.msk [vmem:[#allocation2 + $0x18] sm:$0xf] %vm26_vm1, %v1874_v2 }
   0x2   :  { %29 = vst.msk [vmem:[#allocation2 + $0x14] sm:$0xf] %vm26_vm1, %v1874_v2  ;;  %30 = vst.msk [vmem:[#allocation2 + $0x2c] sm:$0xf] %vm26_vm1, %v1874_v2  ;;  %v33_v3 = vld [vmem:[%s2645_s0 + $0x10] sm:$0xff]  ;;  %v34_v4 = vld [vmem:[%s2645_s0 + $0x18] sm:$0xff] }
   0x3   :  { %547 = vst [vmem:[#allocation3] sm:$0x3] %v1874_v2  ;;  %548 = vst [vmem:[#allocation3 + $0x18] sm:$0x3] %v1874_v2  ;;  %v213_v5 = vld [vmem:[%s2646_s1 + $0x80] sm:$0xff]  ;;  %v214_v6 = vld [vmem:[%s2646_s1 + $0x88] sm:$0xff] }
   0x4   :  { %549 = vst [vmem:[#allocation3 + $0x12] sm:$0x3] %v1874_v2  ;;  %550 = vst [vmem:[#allocation3 + $0x2a] sm:$0x3] %v1874_v2  ;;  %v1648_v7 = vpack.c.bf16 %v214_v6, %v213_v5  ;;  %v197_v8 = vld [vmem:[%s2646_s1] sm:$0xff]  ;;  %v198_v9 = vld [vmem:[%s2646_s1 + $0x8] sm:$0xff] }
   0x5   :  { %36 = vst.msk [vmem:[#allocation2 + $0x4] sm:$0xff] %vm35_vm0, %v31_v0  ;;  %37 = vst.msk [vmem:[#allocation2 + $0xc] sm:$0xff] %vm35_vm0, %v32_v1  ;;  %v215_v10 = vld [vmem:[%s2646_s1 + $0x90] sm:$0xff]  ;;  %v1650_v11 = vpack.c.bf16 %v198_v9, %v197_v8  ;;  %v216_v12 = vld [vmem:[%s2646_s1 + $0x98] sm:$0xff]  ;;  %vm961_vm3 = vcmask 517120  }
   0x6   :  { %38 = vst.msk [vmem:[#allocation2 + $0x1c] sm:$0xff] %vm35_vm0, %v33_v3  ;;  %39 = vst.msk [vmem:[#allocation2 + $0x24] sm:$0xff] %vm35_vm0, %v34_v4  ;;  %v199_v13 = vld [vmem:[%s2646_s1 + $0x10] sm:$0xff]  ;;  %v200_v14 = vld [vmem:[%s2646_s1 + $0x18] sm:$0xff]  ;;  %1649 = vmatprep.subr.bf16.mxu0 %v1648_v7  ;;  %v1652_v15 = vpack.c.bf16 %v216_v12, %v215_v10 }
   0x7   :  { %v217_v16 = vld [vmem:[%s2646_s1 + $0xa0] sm:$0xff]  ;;  %v218_v17 = vld [vmem:[%s2646_s1 + $0xa8] sm:$0xff]  ;;  %1651 = vmatpush3.bf16.msra.mxu0 %v1650_v11  ;;  %v1654_v19 = vpack.c.bf16 %v200_v14, %v199_v13  ;;  %v219_v21 = vld [vmem:[%s2646_s1 + $0xb0] sm:$0xff]  ;;  %962 = vst.msk [vmem:[#allocation4] sm:$0x3] %vm961_vm3, %v1874_v2 }
   0x8   :  { %v201_v18 = vld [vmem:[%s2646_s1 + $0x20] sm:$0xff]  ;;  %1653 = vmatprep.subr.bf16.mxu0 %v1652_v15  ;;  %v202_v20 = vld [vmem:[%s2646_s1 + $0x28] sm:$0xff]  ;;  %v1656_v23 = vpack.c.bf16 %v218_v17, %v217_v16  ;;  %v220_v29 = vld [vmem:[%s2646_s1 + $0xb8] sm:$0xff]  ;;  %963 = vst.msk [vmem:[#allocation4 + $0x18] sm:$0x3] %vm961_vm3, %v1874_v2 }
   0x9   :  { %v245_v22 = vld [vmem:[%s2646_s1 + $0x180] sm:$0xff]  ;;  %v246_v24 = vld [vmem:[%s2646_s1 + $0x188] sm:$0xff]  ;;  %v1658_v34 = vpack.c.bf16 %v202_v20, %v201_v18  ;;  %v1660_v35 = vpack.c.bf16 %v220_v29, %v219_v21  ;;  %v203_v36 = vld [vmem:[%s2646_s1 + $0x30] sm:$0xff]  ;;  %964 = vst.msk [vmem:[#allocation4 + $0x12] sm:$0x3] %vm961_vm3, %v1874_v2 }
   0xa   :  { %v229_v25 = vld [vmem:[%s2646_s1 + $0x100] sm:$0xff]  ;;  %v230_v26 = vld [vmem:[%s2646_s1 + $0x108] sm:$0xff]  ;;  %v1680_v30 = vpack.c.bf16 %v246_v24, %v245_v22  ;;  %v204_v37 = vld [vmem:[%s2646_s1 + $0x38] sm:$0xff]  ;;  %965 = vst.msk [vmem:[#allocation4 + $0x2a] sm:$0x3] %vm961_vm3, %v1874_v2 }
   0xb   :  { %v1682_v31 = vpack.c.bf16 %v230_v26, %v229_v25  ;;  %1655 = vmatpush3.bf16.msra.mxu0 %v1654_v19  ;;  %v221_v40 = vld [vmem:[%s2646_s1 + $0xc0] sm:$0xff]  ;;  %v222_v41 = vld [vmem:[%s2646_s1 + $0xc8] sm:$0xff]  ;;  %v1662_v42 = vpack.c.bf16 %v204_v37, %v203_v36  ;;  %v247_v45 = vld [vmem:[%s2646_s1 + $0x190] sm:$0xff] }
   0xc   :  { %v82_v27 = vld [vmem:[#allocation2 + $0xb] sm:$0xff]  ;;  %v81_v28 = vld [vmem:[#allocation2 + $0x3] sm:$0xff]  ;;  %1681 = vmatprep.subr.bf16.mxu1 %v1680_v30  ;;  %1657 = vmatprep.subr.bf16.mxu0 %v1656_v23  ;;  %v1664_v46 = vpack.c.bf16 %v222_v41, %v221_v40  ;;  %v248_v47 = vld [vmem:[%s2646_s1 + $0x198] sm:$0xff] }
   0xd   :  { %91 = vrot.lane.b32.xlu1 %v82_v27, %s1875_s20  ;;  %89 = vrot.lane.b32.xlu0 %v81_v28, %s1875_s20  ;;  %v49_v32 = vld [vmem:[#allocation2 + $0x9] sm:$0xff]  ;;  %v48_v33 = vld [vmem:[#allocation2 + $0x1] sm:$0xff]  ;;  %v50_v38 = vld [vmem:[#allocation2 + $0x19] sm:$0xff]  ;;  %v1684_v51 = vpack.c.bf16 %v248_v47, %v247_v45 }
   0xe   :  { %1683 = vmatpush3.bf16.msra.mxu1 %v1682_v31  ;;  %v83_v39 = vld [vmem:[#allocation2 + $0x1b] sm:$0xff]  ;;  %v206_v44 = vld [vmem:[%s2646_s1 + $0x48] sm:$0xff]  ;;  %v231_v48 = vld [vmem:[%s2646_s1 + $0x110] sm:$0xff] }
   0xf   :  { %1659 = vmatpush3.bf16.msra.mxu0 %v1658_v34  ;;  %v205_v43 = vld [vmem:[%s2646_s1 + $0x40] sm:$0xff]  ;;  %v232_v49 = vld [vmem:[%s2646_s1 + $0x118] sm:$0xff]  ;;  %v223_v53 = vld [vmem:[%s2646_s1 + $0xd0] sm:$0xff]  ;;  %1685 = vmatprep.subr.bf16.mxu1 %v1684_v51 }
  0x10   :  { %1661 = vmatprep.subr.bf16.mxu0 %v1660_v35  ;;  %v145_v50 = vld [vmem:[#allocation2 + $0x7] sm:$0xff]  ;;  %v1686_v52 = vpack.c.bf16 %v232_v49, %v231_v48  ;;  %v224_v54 = vld [vmem:[%s2646_s1 + $0xd8] sm:$0xff]  ;;  %v207_v58 = vld [vmem:[%s2646_s1 + $0x50] sm:$0xff]  ;;  %v1666_v59 = vpack.c.bf16 %v206_v44, %v205_v43 }
  0x11   :  { %58 = vrot.lane.b32.xlu1 %v49_v32, %s1875_s20  ;;  %56 = vrot.lane.b32.xlu0 %v48_v33, %s1875_s20  ;;  %v74_v55 = vld [vmem:[#allocation2 + $0xa] sm:$0xff]  ;;  %v73_v57 = vld [vmem:[#allocation2 + $0x2] sm:$0xff]  ;;  %v1668_v63 = vpack.c.bf16 %v224_v54, %v223_v53  ;;  %v208_v0 = vld [vmem:[%s2646_s1 + $0x58] sm:$0xff] }
  0x12   :  { %v84_v56 = vld [vmem:[#allocation2 + $0x23] sm:$0xff]  ;;  %78 = vst.msk [vmem:[#allocation5 + $0x30] sm:$0xff] %vm35_vm0, %v74_v55  ;;  %77 = vst.msk [vmem:[#allocation5 + $0x8] sm:$0xff] %vm35_vm0, %v73_v57  ;;  %1687 = vmatpush3.bf16.msra.mxu1 %v1686_v52  ;;  %v251_v11 = vld [vmem:[%s2646_s1 + $0x1b0] sm:$0xff]  ;;  %v1670_v13 = vpack.c.bf16 %v208_v0, %v207_v58 }
  0x13   :  { %1663 = vmatpush3.bf16.msra.mxu0 %v1662_v42  ;;  %v249_v60 = vld [vmem:[%s2646_s1 + $0x1a0] sm:$0xff]  ;;  %v250_v61 = vld [vmem:[%s2646_s1 + $0x1a8] sm:$0xff]  ;;  %v42_v12 = vld [vmem:[#allocation2 + $0x18] sm:$0xff] }
  0x14   :  { %v233_v62 = vld [vmem:[%s2646_s1 + $0x120] sm:$0xff]  ;;  %1665 = vmatprep.subr.bf16.mxu0 %v1664_v46  ;;  %v1688_v1 = vpack.c.bf16 %v250_v61, %v249_v60  ;;  %v234_v3 = vld [vmem:[%s2646_s1 + $0x128] sm:$0xff]  ;;  %v252_v14 = vld [vmem:[%s2646_s1 + $0x1b8] sm:$0xff]  ;;  %46 = vst.msk [vmem:[#allocation5 + $0x50] sm:$0xff] %vm35_vm0, %v42_v12 }
  0x15   :  { %60 = vrot.lane.b32.xlu1 %v50_v38, %s1875_s20  ;;  %93 = vrot.lane.b32.xlu0 %v83_v39, %s1875_s20  ;;  %v225_v4 = vld [vmem:[%s2646_s1 + $0xe0] sm:$0xff]  ;;  %v1690_v6 = vpack.c.bf16 %v234_v3, %v233_v62  ;;  %v226_v7 = vld [vmem:[%s2646_s1 + $0xe8] sm:$0xff]  ;;  %v1692_v20 = vpack.c.bf16 %v252_v14, %v251_v11 }
  0x16   :  { %v113_v5 = vld [vmem:[#allocation2 + $0x5] sm:$0xff]  ;;  %1689 = vmatprep.subr.bf16.mxu1 %v1688_v1  ;;  %v235_v15 = vld [vmem:[%s2646_s1 + $0x130] sm:$0xff]  ;;  %v236_v16 = vld [vmem:[%s2646_s1 + $0x138] sm:$0xff]  ;;  %v1672_v17 = vpack.c.bf16 %v226_v7, %v225_v4 }
  0x17   :  { %v41_v8 = vld [vmem:[#allocation2 + $0x8] sm:$0xff]  ;;  %v40_v9 = vld [vmem:[#allocation2] sm:$0xff]  ;;  %1667 = vmatpush3.bf16.msra.mxu0 %v1666_v59  ;;  %1691 = vmatpush3.bf16.msra.mxu1 %v1690_v6  ;;  %v1694_v21 = vpack.c.bf16 %v236_v16, %v235_v15  ;;  %v227_v25 = vld [vmem:[%s2646_s1 + $0xf0] sm:$0xff] }
  0x18   :  { %v51_v10 = vld [vmem:[#allocation2 + $0x21] sm:$0xff]  ;;  %45 = vst.msk [vmem:[#allocation5 + $0x28] sm:$0xff] %vm35_vm0, %v41_v8  ;;  %44 = vst.msk [vmem:[#allocation5] sm:$0xff] %vm35_vm0, %v40_v9  ;;  %1669 = vmatprep.subr.bf16.mxu0 %v1668_v63  ;;  %v146_v23 = vld [vmem:[#allocation2 + $0xf] sm:$0xff]  ;;  %1693 = vmatprep.subr.bf16.mxu1 %v1692_v20 }
  0x19   :  { %153 = vrot.lane.b32.xlu1 %v145_v50, %s1875_s20  ;;  %95 = vrot.lane.b32.xlu0 %v84_v56, %s1875_s20  ;;  %173 = vst.msk [vmem:[#allocation5 + $0x20] sm:$0xff] %vm35_vm0, %v41_v8  ;;  %v209_v18 = vld [vmem:[%s2646_s1 + $0x60] sm:$0xff]  ;;  %v210_v19 = vld [vmem:[%s2646_s1 + $0x68] sm:$0xff]  ;;  %v170_v9 = vld [vmem:[#allocation2 + $0x10] sm:$0xff] }
  0x1a   :  { %v75_v22 = vld [vmem:[#allocation2 + $0x1a] sm:$0xff]  ;;  %v114_v24 = vld [vmem:[#allocation2 + $0xd] sm:$0xff]  ;;  %v1674_v33 = vpack.c.bf16 %v210_v19, %v209_v18  ;;  %v76_v40 = vld [vmem:[#allocation2 + $0x22] sm:$0xff]  ;;  %174 = vst.msk [vmem:[#allocation5 + $0x48] sm:$0xff] %vm35_vm0, %v170_v9 }
  0x1b   :  { %v228_v26 = vld [vmem:[%s2646_s1 + $0xf8] sm:$0xff]  ;;  %79 = vst.msk [vmem:[#allocation5 + $0x58] sm:$0xff] %vm35_vm0, %v75_v22  ;;  %v253_v27 = vld [vmem:[%s2646_s1 + $0x1c0] sm:$0xff]  ;;  %v211_v28 = vld [vmem:[%s2646_s1 + $0x70] sm:$0xff]  ;;  %1671 = vmatpush3.bf16.msra.mxu0 %v1670_v13  ;;  %1695 = vmatpush3.bf16.msra.mxu1 %v1694_v21 }
  0x1c   :  { %v212_v29 = vld [vmem:[%s2646_s1 + $0x78] sm:$0xff]  ;;  %v254_v30 = vld [vmem:[%s2646_s1 + $0x1c8] sm:$0xff]  ;;  %v237_v31 = vld [vmem:[%s2646_s1 + $0x140] sm:$0xff]  ;;  %1673 = vmatprep.subr.bf16.mxu0 %v1672_v17  ;;  %v1676_v38 = vpack.c.bf16 %v228_v26, %v227_v25  ;;  %80 = vst.msk [vmem:[#allocation5 + $0x80] sm:$0xff] %vm35_vm0, %v76_v40 }
  0x1d   :  { %121 = vrot.lane.b32.xlu1 %v113_v5, %s1875_s20  ;;  %62 = vrot.lane.b32.xlu0 %v51_v10, %s1875_s20  ;;  %v137_v32 = vld [vmem:[#allocation2 + $0x6] sm:$0xff]  ;;  %v1696_v34 = vpack.c.bf16 %v254_v30, %v253_v27  ;;  %v255_v41 = vld [vmem:[%s2646_s1 + $0x1d0] sm:$0xff]  ;;  %v256_v42 = vld [vmem:[%s2646_s1 + $0x1d8] sm:$0xff]  ;;  %v1678_v50 = vpack.c.bf16 %v212_v29, %v211_v28 }
  0x1e   :  { %v238_v35 = vld [vmem:[%s2646_s1 + $0x148] sm:$0xff]  ;;  %v261_v36 = vld [vmem:[%s2646_s1 + $0x200] sm:$0xff]  ;;  %141 = vst.msk [vmem:[#allocation5 + $0x18] sm:$0xff] %vm35_vm0, %v137_v32  ;;  %v1700_v43 = vpack.c.bf16 %v256_v42, %v255_v41  ;;  %v239_v44 = vld [vmem:[%s2646_s1 + $0x150] sm:$0xff] }
  0x1f   :  { %v262_v37 = vld [vmem:[%s2646_s1 + $0x208] sm:$0xff]  ;;  %v1698_v39 = vpack.c.bf16 %v238_v35, %v237_v31  ;;  %1697 = vmatprep.subr.bf16.mxu1 %v1696_v34  ;;  %v240_v45 = vld [vmem:[%s2646_s1 + $0x158] sm:$0xff]  ;;  %v43_v48 = vld [vmem:[#allocation2 + $0x20] sm:$0xff]  ;;  %1675 = vmatpush3.bf16.msra.mxu0 %v1674_v33 }
  0x20   :  { %v105_v46 = vld [vmem:[#allocation2 + $0x4] sm:$0xff]  ;;  %47 = vst.msk [vmem:[#allocation5 + $0x78] sm:$0xff] %vm35_vm0, %v43_v48  ;;  %175 = vst.msk [vmem:[#allocation5 + $0x70] sm:$0xff] %vm35_vm0, %v43_v48  ;;  %1677 = vmatprep.subr.bf16.mxu0 %v1676_v38  ;;  %v2144_v53 = vpack.c.bf16 %v262_v37, %v261_v36  ;;  %v1702_v54 = vpack.c.bf16 %v240_v45, %v239_v44  ;;  %v138_v55 = vld [vmem:[#allocation2 + $0xe] sm:$0xff] }
  0x21   :  { %155 = vrot.lane.b32.xlu0 %v146_v23, %s1875_s20  ;;  %123 = vrot.lane.b32.xlu1 %v114_v24, %s1875_s20  ;;  %v147_v47 = vld [vmem:[#allocation2 + $0x1f] sm:$0xff]  ;;  %109 = vst.msk [vmem:[#allocation5 + $0x10] sm:$0xff] %vm35_vm0, %v105_v46  ;;  %v258_v52 = vld [vmem:[%s2646_s1 + $0x1e8] sm:$0xff]  ;;  %142 = vst.msk [vmem:[#allocation5 + $0x40] sm:$0xff] %vm35_vm0, %v138_v55 }
  0x22   :  { %v115_v49 = vld [vmem:[#allocation2 + $0x1d] sm:$0xff]  ;;  %1699 = vmatpush3.bf16.msra.mxu1 %v1698_v39  ;;  %v148_v56 = vld [vmem:[#allocation2 + $0x27] sm:$0xff]  ;;  %v259_v60 = vld [vmem:[%s2646_s1 + $0x1f0] sm:$0xff] }
  0x23   :  { %v257_v51 = vld [vmem:[%s2646_s1 + $0x1e0] sm:$0xff]  ;;  %1701 = vmatprep.subr.bf16.mxu1 %v1700_v43  ;;  %v242_v59 = vld [vmem:[%s2646_s1 + $0x168] sm:$0xff]  ;;  %v260_v61 = vld [vmem:[%s2646_s1 + $0x1f8] sm:$0xff]  ;;  %1679 = vmatpush3.bf16.msra.mxu0 %v1678_v50 }
  0x24   :  { %v1704_v57 = vpack.c.bf16 %v258_v52, %v257_v51  ;;  %v241_v58 = vld [vmem:[%s2646_s1 + $0x160] sm:$0xff]  ;;  %v106_v62 = vld [vmem:[#allocation2 + $0xc] sm:$0xff]  ;;  %1713 = vmatprep.subr.bf16.mxu0 %v2144_v53  ;;  %v244_v4 = vld [vmem:[%s2646_s1 + $0x178] sm:$0xff]  ;;  %v1708_v7 = vpack.c.bf16 %v260_v61, %v259_v60 }
  0x25   :  { %157 = vrot.lane.b32.xlu0 %v147_v47, %s1875_s20  ;;  %125 = vrot.lane.b32.xlu1 %v115_v49, %s1875_s20  ;;  %v116_v63 = vld [vmem:[#allocation2 + $0x25] sm:$0xff]  ;;  %110 = vst.msk [vmem:[#allocation5 + $0x38] sm:$0xff] %vm35_vm0, %v106_v62  ;;  %v243_v0 = vld [vmem:[%s2646_s1 + $0x170] sm:$0xff]  ;;  %v1706_v3 = vpack.c.bf16 %v242_v59, %v241_v58  ;;  %v107_v5 = vld [vmem:[#allocation2 + $0x1c] sm:$0xff] }
  0x26   :  { %v139_v1 = vld [vmem:[#allocation2 + $0x1e] sm:$0xff]  ;;  %1703 = vmatpush3.bf16.msra.mxu1 %v1702_v54  ;;  %v140_v6 = vld [vmem:[#allocation2 + $0x26] sm:$0xff]  ;;  %111 = vst.msk [vmem:[#allocation5 + $0x60] sm:$0xff] %vm35_vm0, %v107_v5  ;;  %v1710_v13 = vpack.c.bf16 %v244_v4, %v243_v0  ;;  %v263_v22 = vld [vmem:[%s2646_s1 + $0x210] sm:$0xff] }
  0x27   :  { %143 = vst.msk [vmem:[#allocation5 + $0x68] sm:$0xff] %vm35_vm0, %v139_v1  ;;  %1705 = vmatprep.subr.bf16.mxu1 %v1704_v57  ;;  %144 = vst.msk [vmem:[#allocation5 + $0x90] sm:$0xff] %vm35_vm0, %v140_v6  ;;  %v108_v8 = vld [vmem:[#allocation2 + $0x24] sm:$0xff]  ;;  %v264_v23 = vld [vmem:[%s2646_s1 + $0x218] sm:$0xff] }
  0x28   :  { %v172_v10 = vld [vmem:[#allocation2 + $0x28] sm:$0xff]  ;;  %112 = vst.msk [vmem:[#allocation5 + $0x88] sm:$0xff] %vm35_vm0, %v108_v8  ;;  %v631_v11 = vld [vmem:[%s2647_s3 + $0x80] sm:$0xff]  ;;  %v1716_v24 = vpack.c.bf16 %v264_v23, %v263_v22  ;;  %v267_v32 = vld [vmem:[%s2646_s1 + $0x230] sm:$0xff] }
  0x29   :  { %159 = vrot.lane.b32.xlu0 %v148_v56, %s1875_s20  ;;  %127 = vrot.lane.b32.xlu1 %v116_v63, %s1875_s20  ;;  %176 = vst.msk [vmem:[#allocation5 + $0x98] sm:$0xff] %vm35_vm0, %v172_v10  ;;  %v632_v12 = vld [vmem:[%s2647_s3 + $0x88] sm:$0xff]  ;;  %v265_v28 = vld [vmem:[%s2646_s1 + $0x220] sm:$0xff]  ;;  %v181_v46 = vld [vmem:[#allocation5 + $0x20] sm:$0xff] }
  0x2a   :  { %1707 = vmatpush3.bf16.msra.mxu1 %v1706_v3  ;;  %v1728_v14 = vpack.c.bf16 %v632_v12, %v631_v11  ;;  %v266_v29 = vld [vmem:[%s2646_s1 + $0x228] sm:$0xff]  ;;  %v268_v37 = vld [vmem:[%s2646_s1 + $0x238] sm:$0xff]  ;;  %v615_v39 = vld [vmem:[%s2647_s3] sm:$0xff] }
  0x2b   :  { %1709 = vmatprep.subr.bf16.mxu1 %v1708_v7  ;;  %v1720_v31 = vpack.c.bf16 %v266_v29, %v265_v28  ;;  %v1724_v38 = vpack.c.bf16 %v268_v37, %v267_v32  ;;  %v616_v40 = vld [vmem:[%s2647_s3 + $0x8] sm:$0xff]  ;;  %v186_v52 = vld [vmem:[#allocation5 + $0x48] sm:$0xff]  ;;  %v633_v63 = vld [vmem:[%s2647_s3 + $0x90] sm:$0xff] }
  0x2c   :  { %v1730_v47 = vpack.c.bf16 %v616_v40, %v615_v39  ;;  %v634_v0 = vld [vmem:[%s2647_s3 + $0x98] sm:$0xff]  ;;  %v617_v3 = vld [vmem:[%s2647_s3 + $0x10] sm:$0xff]  ;;  %v663_v6 = vld [vmem:[%s2647_s3 + $0x180] sm:$0xff] }
  0x2d   :  { %v1732_v1 = vpack.c.bf16 %v634_v0, %v633_v63  ;;  %v618_v4 = vld [vmem:[%s2647_s3 + $0x18] sm:$0xff]  ;;  %v664_v7 = vld [vmem:[%s2647_s3 + $0x188] sm:$0xff]  ;;  %v647_v9 = vld [vmem:[%s2647_s3 + $0x100] sm:$0xff] }
  0x2e   :  { %1711 = vmatpush3.bf16.msra.mxu1 %v1710_v13  ;;  %v1734_v5 = vpack.c.bf16 %v618_v4, %v617_v3  ;;  %v1760_v8 = vpack.c.bf16 %v664_v7, %v663_v6  ;;  %v648_v10 = vld [vmem:[%s2647_s3 + $0x108] sm:$0xff]  ;;  %v635_v12 = vld [vmem:[%s2647_s3 + $0xa0] sm:$0xff]  ;;  %v650_v22 = vld [vmem:[%s2647_s3 + $0x118] sm:$0xff] }
  0x2f   :  { %1729 = vmatprep.subr.bf16.mxu1 %v1728_v14  ;;  %v1762_v11 = vpack.c.bf16 %v648_v10, %v647_v9  ;;  %v636_v13 = vld [vmem:[%s2647_s3 + $0xa8] sm:$0xff]  ;;  %v622_v28 = vld [vmem:[%s2647_s3 + $0x38] sm:$0xff]  ;;  %v623_v39 = vld [vmem:[%s2647_s3 + $0x40] sm:$0xff] }
  0x30   :  { %v196_v58 = vld [vmem:[#allocation5 + $0x98] sm:$0xff]  ;;  %v1736_v14 = vpack.c.bf16 %v636_v13, %v635_v12  ;;  %v627_v63 = vld [vmem:[%s2647_s3 + $0x60] sm:$0xff]  ;;  %v673_v3 = vld [vmem:[%s2647_s3 + $0x1d0] sm:$0xff] }
  0x31   :  { %v640_v37 = vld [vmem:[%s2647_s3 + $0xc8] sm:$0xff]  ;;  %v674_v4 = vld [vmem:[%s2647_s3 + $0x1d8] sm:$0xff]  ;;  %v657_v6 = vld [vmem:[%s2647_s3 + $0x150] sm:$0xff] }
  0x32   :  { %v624_v40 = vld [vmem:[%s2647_s3 + $0x48] sm:$0xff]  ;;  %v658_v7 = vld [vmem:[%s2647_s3 + $0x158] sm:$0xff]  ;;  %v645_v9 = vld [vmem:[%s2647_s3 + $0xf0] sm:$0xff] }
  0x33   :  { %v628_v0 = vld [vmem:[%s2647_s3 + $0x68] sm:$0xff]  ;;  %v646_v10 = vld [vmem:[%s2647_s3 + $0xf8] sm:$0xff]  ;;  %v629_v12 = vld [vmem:[%s2647_s3 + $0x70] sm:$0xff] }
  0x34   :  { %v630_v13 = vld [vmem:[%s2647_s3 + $0x78] sm:$0xff]  ;;  %v1091_v2 = vld [vmem:[%s2649_s5 + $0x128] sm:$0xff] }
  0x7f   :  { %v92_v15 = vpop.permute.xlu1 %91  ;;  %v90_v16 = vpop.permute.xlu0 %89 }
  0x80   :  { %102 = vst.msk [vmem:[#allocation5 + $0x30] sm:$0xff] %vm68_vm2, %v92_v15  ;;  %101 = vst.msk [vmem:[#allocation5 + $0x8] sm:$0xff] %vm68_vm2, %v90_v16  ;;  %v619_v15 = vld [vmem:[%s2647_s3 + $0x20] sm:$0xff]  ;;  %v620_v16 = vld [vmem:[%s2647_s3 + $0x28] sm:$0xff] }
  0x83   :  { %v59_v17 = vpop.permute.xlu1 %58  ;;  %v57_v18 = vpop.permute.xlu0 %56 }
  0x84   :  { %70 = vst.msk [vmem:[#allocation5 + $0x28] sm:$0xff] %vm68_vm2, %v59_v17  ;;  %69 = vst.msk [vmem:[#allocation5] sm:$0xff] %vm68_vm2, %v57_v18  ;;  %v1738_v17 = vpack.c.bf16 %v620_v16, %v619_v15  ;;  %v665_v18 = vld [vmem:[%s2647_s3 + $0x190] sm:$0xff]  ;;  %v675_v15 = vld [vmem:[%s2647_s3 + $0x1e0] sm:$0xff] }
  0x85   :  { %v676_v16 = vld [vmem:[%s2647_s3 + $0x1e8] sm:$0xff] }
  0x87   :  { %v61_v19 = vpop.permute.xlu1 %60  ;;  %v94_v20 = vpop.permute.xlu0 %93  ;;  %v178_v21 = vld [vmem:[#allocation5 + $0x8] sm:$0xff]  ;;  %v183_v30 = vld [vmem:[#allocation5 + $0x30] sm:$0xff] }
  0x88   :  { %71 = vst.msk [vmem:[#allocation5 + $0x50] sm:$0xff] %vm68_vm2, %v61_v19  ;;  %103 = vst.msk [vmem:[#allocation5 + $0x58] sm:$0xff] %vm68_vm2, %v94_v20  ;;  %352 = vmatprep.mubr.f32.mxu0 %v178_v21  ;;  %v666_v19 = vld [vmem:[%s2647_s3 + $0x198] sm:$0xff]  ;;  %v649_v21 = vld [vmem:[%s2647_s3 + $0x110] sm:$0xff] }
  0x89   :  { %v1764_v20 = vpack.c.bf16 %v666_v19, %v665_v18  ;;  %v1766_v23 = vpack.c.bf16 %v650_v22, %v649_v21  ;;  %v659_v18 = vld [vmem:[%s2647_s3 + $0x160] sm:$0xff]  ;;  %v660_v19 = vld [vmem:[%s2647_s3 + $0x168] sm:$0xff] }
  0x8a   :  { %v679_v21 = vld [vmem:[%s2647_s3 + $0x200] sm:$0xff]  ;;  %v680_v22 = vld [vmem:[%s2647_s3 + $0x208] sm:$0xff] }
  0x8b   :  { %v154_v25 = vpop.permute.xlu1 %153  ;;  %v96_v26 = vpop.permute.xlu0 %95  ;;  %v177_v27 = vld [vmem:[#allocation5] sm:$0xff]  ;;  %v182_v35 = vld [vmem:[#allocation5 + $0x28] sm:$0xff] }
  0x8c   :  { %165 = vst.msk [vmem:[#allocation5 + $0x18] sm:$0xff] %vm68_vm2, %v154_v25  ;;  %104 = vst.msk [vmem:[#allocation5 + $0x80] sm:$0xff] %vm68_vm2, %v96_v26  ;;  %353 = vmatmul.mubr.f32.vlgmr.msra.gmra.mrb[0].mxu0 %v177_v27  ;;  %v638_v25 = vld [vmem:[%s2647_s3 + $0xb8] sm:$0xff]  ;;  %v621_v27 = vld [vmem:[%s2647_s3 + $0x30] sm:$0xff] }
  0x8d   :  { %1715 = vmatpush3.bf16.msra.mxu0 %v2144_v53  ;;  %357 = vmatprep.mubr.f32.mxu0 %v183_v30  ;;  %v191_v53 = vld [vmem:[#allocation5 + $0x70] sm:$0xff]  ;;  %v1742_v29 = vpack.c.bf16 %v622_v28, %v621_v27  ;;  %v661_v27 = vld [vmem:[%s2647_s3 + $0x170] sm:$0xff]  ;;  %v662_v28 = vld [vmem:[%s2647_s3 + $0x178] sm:$0xff] }
  0x8e   :  { %1717 = vmatprep.subr.bf16.mxu0 %v1716_v24  ;;  %v667_v30 = vld [vmem:[%s2647_s3 + $0x1a0] sm:$0xff] }
  0x8f   :  { %v122_v33 = vpop.permute.xlu1 %121  ;;  %v63_v34 = vpop.permute.xlu0 %62  ;;  %v188_v36 = vld [vmem:[#allocation5 + $0x58] sm:$0xff]  ;;  %v187_v44 = vld [vmem:[#allocation5 + $0x50] sm:$0xff] }
  0x90   :  { %133 = vst.msk [vmem:[#allocation5 + $0x10] sm:$0xff] %vm68_vm2, %v122_v33  ;;  %72 = vst.msk [vmem:[#allocation5 + $0x78] sm:$0xff] %vm68_vm2, %v63_v34  ;;  %358 = vmatmul.mubr.f32.gmra.mrb[2].mxu0 %v182_v35  ;;  %v651_v33 = vld [vmem:[%s2647_s3 + $0x120] sm:$0xff]  ;;  %v652_v34 = vld [vmem:[%s2647_s3 + $0x128] sm:$0xff] }
  0x91   :  { %1719 = vmatpush3.bf16.msra.mxu0 %v1716_v24  ;;  %362 = vmatprep.mubr.f32.mxu0 %v188_v36  ;;  %v637_v24 = vld [vmem:[%s2647_s3 + $0xb0] sm:$0xff]  ;;  %v1770_v35 = vpack.c.bf16 %v652_v34, %v651_v33  ;;  %v639_v36 = vld [vmem:[%s2647_s3 + $0xc0] sm:$0xff] }
  0x92   :  { %1721 = vmatprep.subr.bf16.mxu0 %v1720_v31  ;;  %v1740_v26 = vpack.c.bf16 %v638_v25, %v637_v24  ;;  %v677_v24 = vld [vmem:[%s2647_s3 + $0x1f0] sm:$0xff]  ;;  %v678_v25 = vld [vmem:[%s2647_s3 + $0x1f8] sm:$0xff] }
  0x93   :  { %v156_v41 = vpop.permute.xlu0 %155  ;;  %v180_v42 = vld [vmem:[#allocation5 + $0x18] sm:$0xff]  ;;  %v124_v43 = vpop.permute.xlu1 %123  ;;  %v193_v45 = vld [vmem:[#allocation5 + $0x80] sm:$0xff] }
  0x94   :  { %166 = vst.msk [vmem:[#allocation5 + $0x40] sm:$0xff] %vm68_vm2, %v156_v41  ;;  %437 = vmatprep.mubr.f32.mxu1 %v180_v42  ;;  %134 = vst.msk [vmem:[#allocation5 + $0x38] sm:$0xff] %vm68_vm2, %v124_v43  ;;  %363 = vmatmul.mubr.f32.gmra.mrb[4].mxu0 %v187_v44  ;;  %v1746_v41 = vpack.c.bf16 %v624_v40, %v623_v39  ;;  %v669_v42 = vld [vmem:[%s2647_s3 + $0x1b0] sm:$0xff]  ;;  %v670_v43 = vld [vmem:[%s2647_s3 + $0x1b8] sm:$0xff] }
  0x95   :  { %1723 = vmatpush3.bf16.msra.mxu0 %v1720_v31  ;;  %367 = vmatprep.mubr.f32.mxu0 %v193_v45  ;;  %v668_v31 = vld [vmem:[%s2647_s3 + $0x1a8] sm:$0xff]  ;;  %v1772_v44 = vpack.c.bf16 %v670_v43, %v669_v42  ;;  %v653_v45 = vld [vmem:[%s2647_s3 + $0x130] sm:$0xff]  ;;  %v1291_v39 = vld [vmem:[%s2648_s2] ss:$0 sm:$0xff] }
  0x96   :  { %1725 = vmatprep.subr.bf16.mxu0 %v1724_v38  ;;  %v1768_v32 = vpack.c.bf16 %v668_v31, %v667_v30 }
  0x97   :  { %v158_v48 = vpop.permute.xlu0 %157  ;;  %v179_v49 = vld [vmem:[#allocation5 + $0x10] sm:$0xff]  ;;  %v126_v50 = vpop.permute.xlu1 %125  ;;  %v192_v51 = vld [vmem:[#allocation5 + $0x78] sm:$0xff] }
  0x98   :  { %167 = vst.msk [vmem:[#allocation5 + $0x68] sm:$0xff] %vm68_vm2, %v158_v48  ;;  %438 = vmatmul.mubr.f32.vlgmr.msra.gmra.mrb[0].mxu1 %v179_v49  ;;  %135 = vst.msk [vmem:[#allocation5 + $0x60] sm:$0xff] %vm68_vm2, %v126_v50  ;;  %368 = vmatmul.mubr.f32.gmra.mrb[6].mxu0 %v192_v51  ;;  %v641_v48 = vld [vmem:[%s2647_s3 + $0xd0] sm:$0xff]  ;;  %v642_v49 = vld [vmem:[%s2647_s3 + $0xd8] sm:$0xff] }
  0x99   :  { %1727 = vmatpush3.bf16.msra.mxu0 %v1724_v38  ;;  %1582 = vmatprep.mubr.msk.f32.mxu0 %vm35_vm0, %v181_v46  ;;  %v1744_v38 = vpack.c.bf16 %v640_v37, %v639_v36  ;;  %v654_v46 = vld [vmem:[%s2647_s3 + $0x138] sm:$0xff]  ;;  %v1748_v50 = vpack.c.bf16 %v642_v49, %v641_v48  ;;  %v625_v51 = vld [vmem:[%s2647_s3 + $0x50] sm:$0xff] }
  0x9a   :  { %1731 = vmatpush3.bf16.msra.mxu1 %v1730_v47  ;;  %1761 = vmatprep.subr.bf16.mxu0 %v1760_v8  ;;  %v1774_v47 = vpack.c.bf16 %v654_v46, %v653_v45  ;;  %v1782_v8 = vpack.c.bf16 %v658_v7, %v657_v6  ;;  %v682_v6 = vld [vmem:[%s2647_s3 + $0x218] sm:$0xff] }
  0x9b   :  { %v160_v54 = vpop.permute.xlu0 %159  ;;  %v128_v55 = vpop.permute.xlu1 %127  ;;  %v185_v56 = vld [vmem:[#allocation5 + $0x40] sm:$0xff]  ;;  %v184_v57 = vld [vmem:[#allocation5 + $0x38] sm:$0xff]  ;;  %1733 = vmatprep.subr.bf16.mxu1 %v1732_v1  ;;  %v1754_v1 = vpack.c.bf16 %v628_v0, %v627_v63 }
  0x9c   :  { %168 = vst.msk [vmem:[#allocation5 + $0x90] sm:$0xff] %vm68_vm2, %v160_v54  ;;  %136 = vst.msk [vmem:[#allocation5 + $0x88] sm:$0xff] %vm68_vm2, %v128_v55  ;;  %442 = vmatprep.mubr.f32.mxu1 %v185_v56  ;;  %1583 = vmatmul.mubr.msk.f32.vlgmr.msra.gmra.mrb[8].mxu0 %vm35_vm0, %v186_v52  ;;  %v626_v52 = vld [vmem:[%s2647_s3 + $0x58] sm:$0xff]  ;;  %v671_v54 = vld [vmem:[%s2647_s3 + $0x1c0] sm:$0xff] }
  0x9d   :  { %443 = vmatmul.mubr.f32.gmra.mrb[2].mxu1 %v184_v57  ;;  %1585 = vmatprep.mubr.msk.f32.mxu0 %vm35_vm0, %v191_v53  ;;  %v1750_v53 = vpack.c.bf16 %v626_v52, %v625_v51  ;;  %v672_v55 = vld [vmem:[%s2647_s3 + $0x1c8] sm:$0xff]  ;;  %v655_v57 = vld [vmem:[%s2647_s3 + $0x140] sm:$0xff] }
  0x9e   :  { %1735 = vmatpush3.bf16.msra.mxu1 %v1734_v5  ;;  %1763 = vmatpush3.bf16.msra.mxu0 %v1762_v11  ;;  %v1776_v56 = vpack.c.bf16 %v672_v55, %v671_v54  ;;  %v1780_v5 = vpack.c.bf16 %v674_v4, %v673_v3  ;;  %v1756_v11 = vpack.c.bf16 %v646_v10, %v645_v9 }
  0x9f   :  { %v190_v59 = vld [vmem:[#allocation5 + $0x68] sm:$0xff]  ;;  %v189_v60 = vld [vmem:[#allocation5 + $0x60] sm:$0xff]  ;;  %1737 = vmatprep.subr.bf16.mxu1 %v1736_v14  ;;  %1765 = vmatprep.subr.bf16.mxu0 %v1764_v20  ;;  %v1758_v14 = vpack.c.bf16 %v630_v13, %v629_v12  ;;  %v1786_v20 = vpack.c.bf16 %v660_v19, %v659_v18 }
  0xa0   :  { %447 = vmatprep.mubr.f32.mxu1 %v190_v59  ;;  %1586 = vmatmul.mubr.msk.f32.gmra.mrb[10].mxu0 %vm35_vm0, %v196_v58  ;;  %v656_v58 = vld [vmem:[%s2647_s3 + $0x148] sm:$0xff]  ;;  %v685_v19 = vld [vmem:[%s2647_s3 + $0x230] sm:$0xff] }
  0xa1   :  { %448 = vmatmul.mubr.f32.gmra.mrb[4].mxu1 %v189_v60  ;;  %v1778_v59 = vpack.c.bf16 %v656_v58, %v655_v57  ;;  %v643_v60 = vld [vmem:[%s2647_s3 + $0xe0] sm:$0xff] }
  0xa2   :  { %1739 = vmatpush3.bf16.msra.mxu1 %v1738_v17  ;;  %1767 = vmatpush3.bf16.msra.mxu0 %v1766_v23  ;;  %v1784_v17 = vpack.c.bf16 %v676_v16, %v675_v15  ;;  %v2402_v23 = vpack.c.bf16 %v680_v22, %v679_v21  ;;  %v683_v16 = vld [vmem:[%s2647_s3 + $0x220] sm:$0xff] }
  0xa3   :  { %v195_v61 = vld [vmem:[#allocation5 + $0x90] sm:$0xff]  ;;  %v194_v62 = vld [vmem:[#allocation5 + $0x88] sm:$0xff]  ;;  %1741 = vmatprep.subr.bf16.mxu1 %v1740_v26  ;;  %1769 = vmatprep.subr.bf16.mxu0 %v1768_v32  ;;  %v1788_v26 = vpack.c.bf16 %v678_v25, %v677_v24 }
  0xa4   :  { %452 = vmatprep.mubr.f32.mxu1 %v195_v61  ;;  %v644_v61 = vld [vmem:[%s2647_s3 + $0xe8] sm:$0xff] }
  0xa5   :  { %453 = vmatmul.mubr.f32.gmra.mrb[6].mxu1 %v194_v62  ;;  %v1752_v62 = vpack.c.bf16 %v644_v61, %v643_v60 }
  0xa6   :  { %1743 = vmatpush3.bf16.msra.mxu1 %v1742_v29  ;;  %1771 = vmatpush3.bf16.msra.mxu0 %v1770_v35  ;;  %v1790_v29 = vpack.c.bf16 %v662_v28, %v661_v27 }
  0xa7   :  { %1745 = vmatprep.subr.bf16.mxu1 %v1744_v38  ;;  %1773 = vmatprep.subr.bf16.mxu0 %v1772_v44 }
  0xaa   :  { %1747 = vmatpush3.bf16.msra.mxu1 %v1746_v41  ;;  %1775 = vmatpush3.bf16.msra.mxu0 %v1774_v47 }
  0xab   :  { %1749 = vmatprep.subr.bf16.mxu1 %v1748_v50  ;;  %1777 = vmatprep.subr.bf16.mxu0 %v1776_v56 }
  0xae   :  { %1751 = vmatpush3.bf16.msra.mxu1 %v1750_v53  ;;  %1779 = vmatpush3.bf16.msra.mxu0 %v1778_v59 }
  0xaf   :  { %1753 = vmatprep.subr.bf16.mxu1 %v1752_v62  ;;  %1781 = vmatprep.subr.bf16.mxu0 %v1780_v5  ;;  %v681_v5 = vld [vmem:[%s2647_s3 + $0x210] sm:$0xff] }
  0xb2   :  { %1755 = vmatpush3.bf16.msra.mxu1 %v1754_v1  ;;  %1783 = vmatpush3.bf16.msra.mxu0 %v1782_v8 }
  0xb3   :  { %1757 = vmatprep.subr.bf16.mxu1 %v1756_v11  ;;  %1785 = vmatprep.subr.bf16.mxu0 %v1784_v17  ;;  %v684_v17 = vld [vmem:[%s2647_s3 + $0x228] sm:$0xff] }
  0xb4   :  { %v1800_v25 = vpack.c.bf16 %v684_v17, %v683_v16 }
  0xb6   :  { %1759 = vmatpush3.bf16.msra.mxu1 %v1758_v14  ;;  %1787 = vmatpush3.bf16.msra.mxu0 %v1786_v20  ;;  %v1796_v14 = vpack.c.bf16 %v682_v6, %v681_v5  ;;  %v686_v20 = vld [vmem:[%s2647_s3 + $0x238] sm:$0xff]  ;;  %v1056_v6 = vld [vmem:[%s2649_s5 + $0x10] sm:$0xff] }
  0xb7   :  { %1793 = vmatprep.subr.bf16.mxu1 %v2402_v23  ;;  %1789 = vmatprep.subr.bf16.mxu0 %v1788_v26  ;;  %v1804_v26 = vpack.c.bf16 %v686_v20, %v685_v19  ;;  %v1061_v19 = vld [vmem:[%s2649_s5 + $0x38] sm:$0xff]  ;;  %v1078_v20 = vld [vmem:[%s2649_s5 + $0xc0] sm:$0xff] }
  0xba   :  { %1791 = vmatpush3.bf16.msra.mxu0 %v1790_v29  ;;  %v687_v29 = vld [vmem:[%s2647_s3 + $0x240] sm:$0xff] }
 0x15f   :  { %v1334_v30 = vpop.f32.mrb[0].mxu0 }
 0x160   :  { %v1335_v31 = vpop.f32.mrb[1].mxu0 }
 0x161   :  { %v1336_v32 = vadd.f32 %v1335_v31, %v1334_v30  ;;  %v688_v30 = vld [vmem:[%s2647_s3 + $0x248] sm:$0xff]  ;;  %v689_v31 = vld [vmem:[%s2647_s3 + $0x250] sm:$0xff] }
 0x163   :  { %v1337_v33 = vpop.f32.mrb[2].mxu0  ;;  %v355_v44 = vadd.f32 %v1336_v32, %v1291_v39  ;;  %v690_v32 = vld [vmem:[%s2647_s3 + $0x258] sm:$0xff] }
 0x164   :  { %v1338_v34 = vpop.f32.mrb[3].mxu0 }
 0x165   :  { %v1339_v35 = vadd.f32 %v1338_v34, %v1337_v33 }
 0x167   :  { %v1340_v36 = vpop.f32.mrb[4].mxu0  ;;  %v360_v53 = vadd.f32 %v1339_v35, %v1291_v39 }
 0x168   :  { %v1341_v37 = vpop.f32.mrb[5].mxu0 }
 0x169   :  { %v1342_v38 = vadd.f32 %v1341_v37, %v1340_v36  ;;  %v1808_v36 = vpack.c.bf16 %v688_v30, %v687_v29  ;;  %v1064_v30 = vld [vmem:[%s2649_s5 + $0x50] sm:$0xff] }
 0x16b   :  { %v1343_v40 = vpop.f32.mrb[6].mxu0  ;;  %v1378_v41 = vpop.f32.mrb[0].mxu1  ;;  %v365_v61 = vadd.f32 %v1342_v38, %v1291_v39 }
 0x16c   :  { %v1344_v42 = vpop.f32.mrb[7].mxu0  ;;  %v1379_v43 = vpop.f32.mrb[1].mxu1 }
 0x16d   :  { %v1345_v45 = vadd.f32 %v1344_v42, %v1343_v40  ;;  %v1380_v46 = vadd.f32 %v1379_v43, %v1378_v41  ;;  %v691_v40 = vld [vmem:[%s2647_s3 + $0x260] sm:$0xff]  ;;  %v692_v41 = vld [vmem:[%s2647_s3 + $0x268] sm:$0xff]  ;;  %v693_v43 = vld [vmem:[%s2647_s3 + $0x270] sm:$0xff] }
 0x16e   :  { %v1816_v42 = vpack.c.bf16 %v692_v41, %v691_v40 }
 0x16f   :  { %v1584_v47 = vpop.f32.mrb[8].mxu0  ;;  %v440_v48 = vadd.f32 %v1380_v46, %v355_v44  ;;  %v370_v7 = vadd.f32 %v1345_v45, %v1291_v39  ;;  %v1812_v39 = vpack.c.bf16 %v690_v32, %v689_v31  ;;  %v694_v44 = vld [vmem:[%s2647_s3 + $0x278] sm:$0xff] }
 0x170   :  { %v1381_v49 = vpop.f32.mrb[2].mxu1  ;;  %v524_v50 = vpop.f32.mrb[9].mxu0  ;;  %v1820_v45 = vpack.c.bf16 %v694_v44, %v693_v43  ;;  %v1065_v31 = vld [vmem:[%s2649_s5 + $0x58] sm:$0xff] }
 0x171   :  { %v525_v51 = vadd.f32 %v524_v50, %v440_v48  ;;  %v1382_v52 = vpop.f32.mrb[3].mxu1  ;;  %v1087_v50 = vld [vmem:[%s2649_s5 + $0x108] sm:$0xff]  ;;  %v1846_v32 = vpack.c.bf16 %v1065_v31, %v1064_v30 }
 0x172   :  { %v1383_v54 = vadd.f32 %v1382_v52, %v1381_v49  ;;  %v1086_v49 = vld [vmem:[%s2649_s5 + $0x100] sm:$0xff]  ;;  %v1088_v52 = vld [vmem:[%s2649_s5 + $0x110] sm:$0xff] }
 0x173   :  { %v543_v55 = vmax.f32 %v525_v51, 0.0  ;;  %v1587_v56 = vpop.f32.mrb[10].mxu0  ;;  %v1856_v51 = vpack.c.bf16 %v1087_v50, %v1086_v49 }
 0x174   :  { %v445_v57 = vadd.f32 %v1383_v54, %v360_v53  ;;  %v1384_v58 = vpop.f32.mrb[4].mxu1  ;;  %v534_v59 = vpop.f32.mrb[11].mxu0  ;;  %v1089_v53 = vld [vmem:[%s2649_s5 + $0x118] sm:$0xff] }
 0x175   :  { %551 = vst [vmem:[#allocation3 + $0x2] sm:$0xff] %v543_v55  ;;  %v1385_v60 = vpop.f32.mrb[5].mxu1  ;;  %v1860_v54 = vpack.c.bf16 %v1089_v53, %v1088_v52 }
 0x176   :  { %v530_v62 = vadd.f32 %v1584_v47, %v445_v57  ;;  %v1386_v63 = vadd.f32 %v1385_v60, %v1384_v58  ;;  %v1092_v57 = vld [vmem:[%s2649_s5 + $0x130] sm:$0xff]  ;;  %v1093_v58 = vld [vmem:[%s2649_s5 + $0x138] sm:$0xff]  ;;  %v1070_v60 = vld [vmem:[%s2649_s5 + $0x80] sm:$0xff] }
 0x178   :  { %v544_v0 = vmax.f32 %v530_v62, 0.0  ;;  %v1387_v1 = vpop.f32.mrb[6].mxu1  ;;  %v450_v3 = vadd.f32 %v1386_v63, %v365_v61  ;;  %v1071_v61 = vld [vmem:[%s2649_s5 + $0x88] sm:$0xff]  ;;  %v1054_v62 = vld [vmem:[%s2649_s5] sm:$0xff] }
 0x179   :  { %v1388_v4 = vpop.f32.mrb[7].mxu1  ;;  %v1824_v63 = vpack.c.bf16 %v1071_v61, %v1070_v60 }
 0x17a   :  { %552 = vst [vmem:[#allocation3 + $0xa] sm:$0xff] %v544_v0  ;;  %v1389_v8 = vadd.f32 %v1388_v4, %v1387_v1  ;;  %v535_v9 = vadd.f32 %v534_v59, %v450_v3  ;;  %v1868_v59 = vpack.c.bf16 %v1093_v58, %v1092_v57  ;;  %v1072_v1 = vld [vmem:[%s2649_s5 + $0x90] sm:$0xff]  ;;  %v1073_v3 = vld [vmem:[%s2649_s5 + $0x98] sm:$0xff] }
 0x17b   :  { %v1828_v5 = vpack.c.bf16 %v1073_v3, %v1072_v1  ;;  %1825 = vmatprep.subr.bf16.mxu0 %v1824_v63  ;;  %v1082_v3 = vld [vmem:[%s2649_s5 + $0xe0] sm:$0xff] }
 0x17c   :  { %v455_v10 = vadd.f32 %v1389_v8, %v370_v7  ;;  %v545_v11 = vmax.f32 %v535_v9, 0.0  ;;  %v563_v12 = vld [vmem:[#allocation3 + $0x1] sm:$0xff]  ;;  %v1074_v8 = vld [vmem:[%s2649_s5 + $0xa0] sm:$0xff]  ;;  %v1075_v9 = vld [vmem:[%s2649_s5 + $0xa8] sm:$0xff] }
 0x17d   :  { %v555_v13 = vld [vmem:[#allocation3] sm:$0xff]  ;;  %766 = vmatprep.mubr.f32.mxu1 %v563_v12  ;;  %v1057_v7 = vld [vmem:[%s2649_s5 + $0x18] sm:$0xff]  ;;  %v1058_v12 = vld [vmem:[%s2649_s5 + $0x20] sm:$0xff] }
 0x17e   :  { %v540_v15 = vadd.f32 %v1587_v56, %v455_v10  ;;  %553 = vst [vmem:[#allocation3 + $0x1a] sm:$0xff] %v545_v11  ;;  %767 = vmatmul.mubr.f32.vlgmr.msra.gmra.mrb[8].mxu1 %v555_v13  ;;  %v1830_v10 = vpack.c.bf16 %v1057_v7, %v1056_v6  ;;  %v1059_v13 = vld [vmem:[%s2649_s5 + $0x28] sm:$0xff] }
 0x17f   :  { %1795 = vmatpush3.bf16.msra.mxu1 %v2402_v23  ;;  %v1834_v16 = vpack.c.bf16 %v1059_v13, %v1058_v12 }
 0x180   :  { %v546_v18 = vmax.f32 %v540_v15, 0.0  ;;  %1797 = vmatprep.subr.bf16.mxu1 %v1796_v14  ;;  %v1077_v15 = vld [vmem:[%s2649_s5 + $0xb8] sm:$0xff] }
 0x181   :  { %v564_v21 = vld [vmem:[#allocation3 + $0x9] sm:$0xff] }
 0x182   :  { %v579_v22 = vld [vmem:[#allocation3 + $0x3] sm:$0xff]  ;;  %554 = vst [vmem:[#allocation3 + $0x22] sm:$0xff] %v546_v18  ;;  %771 = vmatprep.mubr.f32.mxu1 %v564_v21  ;;  %v580_v23 = vld [vmem:[#allocation3 + $0xb] sm:$0xff]  ;;  %v1079_v21 = vld [vmem:[%s2649_s5 + $0xc8] sm:$0xff] }
 0x183   :  { %v556_v24 = vld [vmem:[#allocation3 + $0x8] sm:$0xff]  ;;  %851 = vmatprep.mubr.f32.mxu0 %v579_v22  ;;  %1799 = vmatpush3.bf16.msra.mxu1 %v1796_v14  ;;  %v1076_v14 = vld [vmem:[%s2649_s5 + $0xb0] sm:$0xff] }
 0x184   :  { %852 = vmatmul.mubr.f32.vlgmr.msra.gmra.mrb[12].mxu0 %v543_v55  ;;  %772 = vmatmul.mubr.f32.gmra.mrb[10].mxu1 %v556_v24  ;;  %v587_v38 = vld [vmem:[#allocation3 + $0x4] sm:$0xff]  ;;  %v588_v46 = vld [vmem:[#allocation3 + $0xc] sm:$0xff]  ;;  %v1836_v17 = vpack.c.bf16 %v1077_v15, %v1076_v14  ;;  %v1840_v24 = vpack.c.bf16 %v1079_v21, %v1078_v20 }
 0x185   :  { %856 = vmatprep.mubr.f32.mxu0 %v580_v23  ;;  %1801 = vmatprep.subr.bf16.mxu1 %v1800_v25  ;;  %v565_v27 = vld [vmem:[#allocation3 + $0x19] sm:$0xff]  ;;  %v1090_v55 = vld [vmem:[%s2649_s5 + $0x120] sm:$0xff] }
 0x186   :  { %v557_v28 = vld [vmem:[#allocation3 + $0x18] sm:$0xff]  ;;  %776 = vmatprep.mubr.f32.mxu1 %v565_v27  ;;  %v1864_v56 = vpack.c.bf16 %v1091_v2, %v1090_v55  ;;  %v1081_v27 = vld [vmem:[%s2649_s5 + $0xd8] sm:$0xff] }
 0x187   :  { %1803 = vmatpush3.bf16.msra.mxu1 %v1800_v25  ;;  %v1062_v25 = vld [vmem:[%s2649_s5 + $0x40] sm:$0xff]  ;;  %v1063_v23 = vld [vmem:[%s2649_s5 + $0x48] sm:$0xff] }
 0x188   :  { %857 = vmatmul.mubr.f32.gmra.mrb[14].mxu0 %v544_v0  ;;  %777 = vmatmul.mubr.f32.gmra.mrb[12].mxu1 %v557_v28  ;;  %v1055_v0 = vld [vmem:[%s2649_s5 + $0x8] sm:$0xff]  ;;  %v1842_v28 = vpack.c.bf16 %v1063_v23, %v1062_v25 }
 0x189   :  { %1805 = vmatprep.subr.bf16.mxu1 %v1804_v26  ;;  %v566_v33 = vld [vmem:[#allocation3 + $0x21] sm:$0xff]  ;;  %v1826_v4 = vpack.c.bf16 %v1055_v0, %v1054_v62 }
 0x18a   :  { %v581_v34 = vld [vmem:[#allocation3 + $0x1b] sm:$0xff]  ;;  %781 = vmatprep.mubr.f32.mxu1 %v566_v33  ;;  %v582_v37 = vld [vmem:[#allocation3 + $0x23] sm:$0xff] }
 0x18b   :  { %v558_v35 = vld [vmem:[#allocation3 + $0x20] sm:$0xff]  ;;  %861 = vmatprep.mubr.f32.mxu0 %v581_v34  ;;  %1807 = vmatpush3.bf16.msra.mxu1 %v1804_v26 }
 0x18c   :  { %862 = vmatmul.mubr.f32.gmra.mrb[16].mxu0 %v545_v11  ;;  %782 = vmatmul.mubr.f32.gmra.mrb[14].mxu1 %v558_v35  ;;  %v589_v47 = vld [vmem:[#allocation3 + $0x1c] sm:$0xff]  ;;  %v590_v48 = vld [vmem:[#allocation3 + $0x24] sm:$0xff]  ;;  %v1832_v11 = vpack.c.bf16 %v1075_v9, %v1074_v8  ;;  %v1066_v8 = vld [vmem:[%s2649_s5 + $0x60] sm:$0xff] }
 0x18d   :  { %866 = vmatprep.mubr.f32.mxu0 %v582_v37  ;;  %1620 = vmatprep.mubr.f32.mxu1 %v587_v38  ;;  %v1080_v26 = vld [vmem:[%s2649_s5 + $0xd0] sm:$0xff]  ;;  %v1067_v9 = vld [vmem:[%s2649_s5 + $0x68] sm:$0xff] }
 0x18e   :  { %1809 = vmatprep.subr.bf16.mxu1 %v1808_v36  ;;  %1827 = vmatpush3.bf16.msra.mxu0 %v1826_v4  ;;  %v1844_v29 = vpack.c.bf16 %v1081_v27, %v1080_v26  ;;  %v1083_v4 = vld [vmem:[%s2649_s5 + $0xe8] sm:$0xff] }
 0x18f   :  { %1811 = vmatpush3.bf16.msra.mxu1 %v1808_v36  ;;  %1829 = vmatprep.subr.bf16.mxu0 %v1828_v5  ;;  %v1296_v36 = vld [vmem:[%s2650_s4] ss:$0 sm:$0xff]  ;;  %v1848_v7 = vpack.c.bf16 %v1083_v4, %v1082_v3 }
 0x190   :  { %867 = vmatmul.mubr.f32.gmra.mrb[18].mxu0 %v546_v18  ;;  %1813 = vmatprep.subr.bf16.mxu1 %v1812_v39  ;;  %v1060_v18 = vld [vmem:[%s2649_s5 + $0x30] sm:$0xff] }
 0x191   :  { %v1838_v22 = vpack.c.bf16 %v1061_v19, %v1060_v18  ;;  %v1085_v18 = vld [vmem:[%s2649_s5 + $0xf8] sm:$0xff]  ;;  %v1068_v19 = vld [vmem:[%s2649_s5 + $0x70] sm:$0xff] }
 0x192   :  { %1831 = vmatpush3.bf16.msra.mxu0 %v1830_v10 }
 0x193   :  { %1815 = vmatpush3.bf16.msra.mxu1 %v1812_v39  ;;  %1833 = vmatprep.subr.bf16.mxu0 %v1832_v11  ;;  %v1850_v11 = vpack.c.bf16 %v1067_v9, %v1066_v8 }
 0x194   :  { %1817 = vmatprep.subr.bf16.mxu1 %v1816_v42 }
 0x196   :  { %1835 = vmatpush3.bf16.msra.mxu0 %v1834_v16 }
 0x197   :  { %1819 = vmatpush3.bf16.msra.mxu1 %v1816_v42  ;;  %1837 = vmatprep.subr.bf16.mxu0 %v1836_v17  ;;  %v1084_v17 = vld [vmem:[%s2649_s5 + $0xf0] sm:$0xff] }
 0x198   :  { %1821 = vmatprep.subr.bf16.mxu1 %v1820_v45  ;;  %v1852_v21 = vpack.c.bf16 %v1085_v18, %v1084_v17 }
 0x19a   :  { %1839 = vmatpush3.bf16.msra.mxu0 %v1838_v22  ;;  %v1069_v22 = vld [vmem:[%s2649_s5 + $0x78] sm:$0xff] }
 0x19b   :  { %1823 = vmatpush3.bf16.msra.mxu1 %v1820_v45  ;;  %1841 = vmatprep.subr.bf16.mxu0 %v1840_v24  ;;  %v1854_v25 = vpack.c.bf16 %v1069_v22, %v1068_v19 }
 0x19c   :  { %1857 = vmatprep.subr.bf16.mxu1 %v1856_v51 }
 0x19e   :  { %1621 = vmatmul.mubr.f32.vlgmr.msra.gmra.mrb[16].mxu1 %v588_v46  ;;  %1843 = vmatpush3.bf16.msra.mxu0 %v1842_v28 }
 0x19f   :  { %1623 = vmatprep.mubr.f32.mxu1 %v589_v47  ;;  %1859 = vmatpush3.bf16.msra.mxu1 %v1856_v51 }
 0x1a0   :  { %1861 = vmatprep.subr.bf16.mxu1 %v1860_v54  ;;  %1845 = vmatprep.subr.bf16.mxu0 %v1844_v29 }
 0x1a2   :  { %1624 = vmatmul.mubr.f32.gmra.mrb[18].mxu1 %v590_v48  ;;  %1847 = vmatpush3.bf16.msra.mxu0 %v1846_v32 }
 0x1a3   :  { %1863 = vmatpush3.bf16.msra.mxu1 %v1860_v54  ;;  %1849 = vmatprep.subr.bf16.mxu0 %v1848_v7  ;;  %v1297_v7 = vld [vmem:[%s2651_s6] ss:$0 sm:$0xff] }
 0x1a4   :  { %1865 = vmatprep.subr.bf16.mxu1 %v1864_v56 }
 0x1a6   :  { %1851 = vmatpush3.bf16.msra.mxu0 %v1850_v11 }
 0x1a7   :  { %1867 = vmatpush3.bf16.msra.mxu1 %v1864_v56  ;;  %1853 = vmatprep.subr.bf16.mxu0 %v1852_v21 }
 0x1a8   :  { %1869 = vmatprep.subr.bf16.mxu1 %v1868_v59 }
 0x1aa   :  { %1855 = vmatpush3.bf16.msra.mxu0 %v1854_v25 }
 0x1ab   :  { %1871 = vmatpush3.bf16.msra.mxu1 %v1868_v59 }
 0x251   :  { %v1434_v33 = vpop.f32.mrb[8].mxu1 }
 0x252   :  { %v1435_v34 = vpop.f32.mrb[9].mxu1 }
 0x253   :  { %v1436_v35 = vadd.f32 %v1435_v34, %v1434_v33 }
 0x255   :  { %v769_v40 = vadd.f32 %v1436_v35, %v1296_v36 }
 0x257   :  { %v1478_v37 = vpop.f32.mrb[12].mxu0  ;;  %v1437_v38 = vpop.f32.mrb[10].mxu1 }
 0x258   :  { %v1479_v39 = vpop.f32.mrb[13].mxu0  ;;  %v1438_v41 = vpop.f32.mrb[11].mxu1 }
 0x259   :  { %v1480_v42 = vadd.f32 %v1479_v39, %v1478_v37  ;;  %v1439_v43 = vadd.f32 %v1438_v41, %v1437_v38 }
 0x25b   :  { %v1481_v44 = vpop.f32.mrb[14].mxu0  ;;  %v854_v45 = vadd.f32 %v1480_v42, %v769_v40  ;;  %v1440_v46 = vpop.f32.mrb[12].mxu1  ;;  %v774_v48 = vadd.f32 %v1439_v43, %v1296_v36 }
 0x25c   :  { %v1482_v47 = vpop.f32.mrb[15].mxu0  ;;  %v1441_v49 = vpop.f32.mrb[13].mxu1 }
 0x25d   :  { %v1483_v50 = vadd.f32 %v1482_v47, %v1481_v44  ;;  %v1442_v51 = vadd.f32 %v1441_v49, %v1440_v46 }
 0x25f   :  { %v1484_v52 = vpop.f32.mrb[16].mxu0  ;;  %v859_v53 = vadd.f32 %v1483_v50, %v774_v48  ;;  %v1443_v54 = vpop.f32.mrb[14].mxu1  ;;  %v779_v2 = vadd.f32 %v1442_v51, %v1296_v36 }
 0x260   :  { %v1485_v55 = vpop.f32.mrb[17].mxu0  ;;  %v1444_v56 = vpop.f32.mrb[15].mxu1 }
 0x261   :  { %v1486_v57 = vadd.f32 %v1485_v55, %v1484_v52  ;;  %v1445_v58 = vadd.f32 %v1444_v56, %v1443_v54 }
 0x263   :  { %v1487_v59 = vpop.f32.mrb[18].mxu0  ;;  %v864_v60 = vadd.f32 %v1486_v57, %v779_v2  ;;  %v784_v62 = vadd.f32 %v1445_v58, %v1296_v36 }
 0x264   :  { %v1488_v61 = vpop.f32.mrb[19].mxu0 }
 0x265   :  { %v1489_v63 = vadd.f32 %v1488_v61, %v1487_v59 }
 0x267   :  { %v869_v0 = vadd.f32 %v1489_v63, %v784_v62 }
 0x271   :  { %v1622_v1 = vpop.f32.mrb[16].mxu1 }
 0x272   :  { %v944_v5 = vadd.f32 %v1622_v1, %v859_v53  ;;  %v938_v6 = vpop.f32.mrb[17].mxu1 }
 0x273   :  { %v939_v10 = vadd.f32 %v938_v6, %v854_v45 }
 0x274   :  { %v958_v12 = vmax.f32 %v944_v5, 0.0 }
 0x275   :  { %v957_v13 = vmax.f32 %v939_v10, 0.0  ;;  %v1625_v14 = vpop.f32.mrb[18].mxu1 }
 0x276   :  { %967 = vst.msk [vmem:[#allocation4 + $0xa] sm:$0xff] %vm35_vm0, %v958_v12  ;;  %v954_v15 = vadd.f32 %v1625_v14, %v869_v0  ;;  %v948_v16 = vpop.f32.mrb[19].mxu1 }
 0x277   :  { %966 = vst.msk [vmem:[#allocation4 + $0x2] sm:$0xff] %vm35_vm0, %v957_v13  ;;  %v949_v20 = vadd.f32 %v948_v16, %v864_v60 }
 0x278   :  { %v960_v24 = vmax.f32 %v954_v15, 0.0 }
 0x279   :  { %v959_v23 = vmax.f32 %v949_v20, 0.0 }
 0x27a   :  { %969 = vst.msk [vmem:[#allocation4 + $0x22] sm:$0xff] %vm35_vm0, %v960_v24 }
 0x27b   :  { %968 = vst.msk [vmem:[#allocation4 + $0x1a] sm:$0xff] %vm35_vm0, %v959_v23 }
 0x27d   :  { %v1035_v26 = vld [vmem:[#allocation4 + $0xc] sm:$0xff] }
 0x27e   :  { %v1003_v27 = vld [vmem:[#allocation4 + $0xa] sm:$0xff]  ;;  %v978_v30 = vld [vmem:[#allocation4 + $0x1] sm:$0xff]  ;;  %1039 = vst.msk [vmem:[#allocation7 + $0x28] sm:$0xff] %vm35_vm0, %v1035_v26 }
 0x27f   :  { %v1034_v28 = vld [vmem:[#allocation4 + $0x4] sm:$0xff]  ;;  %1007 = vst.msk [vmem:[#allocation7 + $0x20] sm:$0xff] %vm35_vm0, %v1003_v27  ;;  %986 = vrot.lane.b32.xlu1 %v978_v30, %s1875_s20 }
 0x280   :  { %v1010_v29 = vld [vmem:[#allocation4 + $0x3] sm:$0xff]  ;;  %1038 = vst.msk [vmem:[#allocation7 + $0x10] sm:$0xff] %vm35_vm0, %v1034_v28  ;;  %v1011_v37 = vld [vmem:[#allocation4 + $0xb] sm:$0xff] }
 0x281   :  { %1018 = vrot.lane.b32.xlu0 %v1010_v29, %s1875_s20  ;;  %v1002_v31 = vld [vmem:[#allocation4 + $0x2] sm:$0xff] }
 0x282   :  { %v970_v32 = vld [vmem:[#allocation4] sm:$0xff]  ;;  %1006 = vst.msk [vmem:[#allocation7 + $0x8] sm:$0xff] %vm35_vm0, %v1002_v31  ;;  %v971_v33 = vld [vmem:[#allocation4 + $0x8] sm:$0xff]  ;;  %v972_v40 = vld [vmem:[#allocation4 + $0x18] sm:$0xff] }
 0x283   :  { %974 = vst.msk [vmem:[#allocation7] sm:$0xff] %vm35_vm0, %v970_v32  ;;  %v1037_v34 = vld [vmem:[#allocation4 + $0x24] sm:$0xff]  ;;  %975 = vst.msk [vmem:[#allocation7 + $0x18] sm:$0xff] %vm35_vm0, %v971_v33  ;;  %v1036_v36 = vld [vmem:[#allocation4 + $0x1c] sm:$0xff] }
 0x284   :  { %v1005_v35 = vld [vmem:[#allocation4 + $0x22] sm:$0xff]  ;;  %1041 = vst.msk [vmem:[#allocation7 + $0x58] sm:$0xff] %vm35_vm0, %v1037_v34  ;;  %1040 = vst.msk [vmem:[#allocation7 + $0x40] sm:$0xff] %vm35_vm0, %v1036_v36  ;;  %v1004_v39 = vld [vmem:[#allocation4 + $0x1a] sm:$0xff] }
 0x285   :  { %v979_v38 = vld [vmem:[#allocation4 + $0x9] sm:$0xff]  ;;  %1009 = vst.msk [vmem:[#allocation7 + $0x50] sm:$0xff] %vm35_vm0, %v1005_v35  ;;  %1020 = vrot.lane.b32.xlu0 %v1011_v37, %s1875_s20  ;;  %1008 = vst.msk [vmem:[#allocation7 + $0x38] sm:$0xff] %vm35_vm0, %v1004_v39  ;;  %v973_v41 = vld [vmem:[#allocation4 + $0x20] sm:$0xff] }
 0x286   :  { %988 = vrot.lane.b32.xlu1 %v979_v38, %s1875_s20  ;;  %976 = vst.msk [vmem:[#allocation7 + $0x30] sm:$0xff] %vm35_vm0, %v972_v40  ;;  %977 = vst.msk [vmem:[#allocation7 + $0x48] sm:$0xff] %vm35_vm0, %v973_v41  ;;  %v1012_v43 = vld [vmem:[#allocation4 + $0x1b] sm:$0xff]  ;;  %v1013_v47 = vld [vmem:[#allocation4 + $0x23] sm:$0xff] }
 0x287   :  { %v1044_v42 = vld [vmem:[#allocation7 + $0x10] sm:$0xff]  ;;  %v1047_v45 = vld [vmem:[#allocation7 + $0x28] sm:$0xff] }
 0x288   :  { %1642 = vmatprep.mubr.msk.f32.mxu1 %vm35_vm0, %v1044_v42  ;;  %v980_v44 = vld [vmem:[#allocation4 + $0x19] sm:$0xff]  ;;  %v981_v48 = vld [vmem:[#allocation4 + $0x21] sm:$0xff] }
 0x289   :  { %1022 = vrot.lane.b32.xlu0 %v1012_v43, %s1875_s20  ;;  %1643 = vmatmul.mubr.msk.f32.vlgmr.msra.gmra.mrb[20].mxu1 %vm35_vm0, %v1047_v45 }
 0x28a   :  { %990 = vrot.lane.b32.xlu1 %v980_v44, %s1875_s20 }
 0x28b   :  { %v1050_v46 = vld [vmem:[#allocation7 + $0x40] sm:$0xff]  ;;  %v1053_v49 = vld [vmem:[#allocation7 + $0x58] sm:$0xff] }
 0x28c   :  { %1645 = vmatprep.mubr.msk.f32.mxu1 %vm35_vm0, %v1050_v46 }
 0x28d   :  { %1024 = vrot.lane.b32.xlu0 %v1013_v47, %s1875_s20  ;;  %1646 = vmatmul.mubr.msk.f32.gmra.mrb[22].mxu1 %vm35_vm0, %v1053_v49 }
 0x28e   :  { %992 = vrot.lane.b32.xlu1 %v981_v48, %s1875_s20 }
 0x2f1   :  { %v987_v51 = vpop.permute.xlu1 %986 }
 0x2f2   :  { %998 = vst.msk [vmem:[#allocation7] sm:$0xff] %vm68_vm2, %v987_v51 }
 0x2f3   :  { %v1019_v50 = vpop.permute.xlu0 %1018 }
 0x2f4   :  { %1030 = vst.msk [vmem:[#allocation7 + $0x8] sm:$0xff] %vm68_vm2, %v1019_v50 }
 0x2f7   :  { %v1021_v52 = vpop.permute.xlu0 %1020 }
 0x2f8   :  { %v989_v53 = vpop.permute.xlu1 %988  ;;  %1031 = vst.msk [vmem:[#allocation7 + $0x20] sm:$0xff] %vm68_vm2, %v1021_v52 }
 0x2f9   :  { %999 = vst.msk [vmem:[#allocation7 + $0x18] sm:$0xff] %vm68_vm2, %v989_v53  ;;  %v1042_v2 = vld [vmem:[#allocation7] sm:$0xff] }
 0x2fb   :  { %v1023_v54 = vpop.permute.xlu0 %1022  ;;  %v1043_v55 = vld [vmem:[#allocation7 + $0x8] sm:$0xff] }
 0x2fc   :  { %1032 = vst.msk [vmem:[#allocation7 + $0x38] sm:$0xff] %vm68_vm2, %v1023_v54  ;;  %v991_v56 = vpop.permute.xlu1 %990  ;;  %1177 = vmatprep.mubr.f32.mxu0 %v1043_v55 }
 0x2fd   :  { %1000 = vst.msk [vmem:[#allocation7 + $0x30] sm:$0xff] %vm68_vm2, %v991_v56  ;;  %1178 = vmatmul.mubr.f32.vlgmr.msra.gmra.mrb[20].mxu0 %v1042_v2 }
 0x2ff   :  { %v1025_v57 = vpop.permute.xlu0 %1024  ;;  %v1046_v58 = vld [vmem:[#allocation7 + $0x20] sm:$0xff] }
 0x300   :  { %v1045_v59 = vld [vmem:[#allocation7 + $0x18] sm:$0xff]  ;;  %1033 = vst.msk [vmem:[#allocation7 + $0x50] sm:$0xff] %vm68_vm2, %v1025_v57  ;;  %v993_v60 = vpop.permute.xlu1 %992  ;;  %1182 = vmatprep.mubr.f32.mxu0 %v1046_v58 }
 0x301   :  { %1001 = vst.msk [vmem:[#allocation7 + $0x48] sm:$0xff] %vm68_vm2, %v993_v60  ;;  %1183 = vmatmul.mubr.f32.gmra.mrb[22].mxu0 %v1045_v59 }
 0x303   :  { %v1049_v61 = vld [vmem:[#allocation7 + $0x38] sm:$0xff] }
 0x304   :  { %1187 = vmatprep.mubr.f32.mxu0 %v1049_v61  ;;  %v1048_v62 = vld [vmem:[#allocation7 + $0x30] sm:$0xff] }
 0x305   :  { %1188 = vmatmul.mubr.f32.gmra.mrb[24].mxu0 %v1048_v62 }
 0x307   :  { %v1052_v63 = vld [vmem:[#allocation7 + $0x50] sm:$0xff] }
 0x308   :  { %1192 = vmatprep.mubr.f32.mxu0 %v1052_v63  ;;  %v1051_v0 = vld [vmem:[#allocation7 + $0x48] sm:$0xff] }
 0x309   :  { %1193 = vmatmul.mubr.f32.gmra.mrb[26].mxu0 %v1051_v0 }
 0x35c   :  { %v1644_v1 = vpop.f32.mrb[20].mxu1 }
 0x35d   :  { %v1264_v3 = vpop.f32.mrb[21].mxu1 }
 0x360   :  { %v1647_v4 = vpop.f32.mrb[22].mxu1 }
 0x361   :  { %v1274_v5 = vpop.f32.mrb[23].mxu1 }
 0x3d0   :  { %v1542_v6 = vpop.f32.mrb[20].mxu0 }
 0x3d1   :  { %v1543_v8 = vpop.f32.mrb[21].mxu0 }
 0x3d2   :  { %v1544_v9 = vadd.f32 %v1543_v8, %v1542_v6 }
 0x3d4   :  { %v1180_v10 = vadd.f32 %v1544_v9, %v1297_v7  ;;  %v1545_v11 = vpop.f32.mrb[22].mxu0 }
 0x3d5   :  { %v1546_v12 = vpop.f32.mrb[23].mxu0 }
 0x3d6   :  { %v1265_v13 = vadd.f32 %v1264_v3, %v1180_v10  ;;  %v1547_v14 = vadd.f32 %v1546_v12, %v1545_v11 }
 0x3d8   :  { %1283 = vst.msk [vmem:[%s2652_s7] sm:$0xff] %vm35_vm0, %v1265_v13  ;;  %v1185_v15 = vadd.f32 %v1547_v14, %v1297_v7  ;;  %v1548_v16 = vpop.f32.mrb[24].mxu0 }
 0x3d9   :  { %v1549_v17 = vpop.f32.mrb[25].mxu0 }
 0x3da   :  { %v1270_v18 = vadd.f32 %v1644_v1, %v1185_v15  ;;  %v1550_v19 = vadd.f32 %v1549_v17, %v1548_v16 }
 0x3dc   :  { %1284 = vst.msk [vmem:[%s2652_s7 + $0x8] sm:$0xff] %vm35_vm0, %v1270_v18  ;;  %v1190_v20 = vadd.f32 %v1550_v19, %v1297_v7  ;;  %v1551_v21 = vpop.f32.mrb[26].mxu0 }
 0x3dd   :  { %v1552_v22 = vpop.f32.mrb[27].mxu0 }
 0x3de   :  { %v1275_v24 = vadd.f32 %v1274_v5, %v1190_v20  ;;  %v1553_v25 = vadd.f32 %v1552_v22, %v1551_v21 }
 0x3e0   :  { %1285 = vst.msk [vmem:[%s2652_s7 + $0x10] sm:$0xff] %vm35_vm0, %v1275_v24  ;;  %v1195_v23 = vadd.f32 %v1553_v25, %v1297_v7 }
 0x3e2   :  { %v1280_v26 = vadd.f32 %v1647_v4, %v1195_v23 }
 0x3e4   :  { %1286 = vst.msk [vmem:[%s2652_s7 + $0x18] sm:$0xff] %vm35_vm0, %v1280_v26 }

</bundles_post_ra>
